<compile_context>
chip_gen: v6e
topology: v6e:2x2x1
jax: 0.10.0
libtpu: 0.0.40
codegen_flags: <defaults>
</compile_context>

<pallas_src>
import jax
import jax.numpy as jnp
from jax.experimental import pallas as pl
from jax.experimental.pallas import tpu as pltpu


def _round_up(x, m):
    return (x + m - 1) // m * m


_NEG_BIAS = -1e30  # masks padded softmax / log-softmax columns


# --------------------------------------------------------------------------------------
# Kernel
# --------------------------------------------------------------------------------------
def _decoder_kernel(
    emb_ref, hid_ref, enc_ref,
    w_attn_e_ref, w_attn_h_ref, b_attn_ref,
    w_comb_e_ref, w_comb_a_ref, b_comb_ref,
    w_ih_ref, b_ih_ref, w_hh_ref, b_hh_ref,
    w_out_ref, b_out_ref,
    logits_ref, lse_ref, hid_out_ref, attn_ref,
    h_sc, m_sc, l_sc,
):
    # grid = (core_split=2 "parallel", V tiles per core "arbitrary")
    v = pl.program_id(1)
    Bp = hid_ref.shape[0]
    Hp = hid_ref.shape[1]
    Lse = enc_ref.shape[1]          # encoder L padded only to a multiple of 8

    # ---------- attention + attn_combine + GRU: once per core, on its first V tile ----------
    @pl.when(v == 0)
    def _prologue():
        emb = emb_ref[...]                                    # (Bp, Hp) bf16
        h32 = hid_ref[...]                                    # (Bp, Hp) f32
        h16 = h32.astype(jnp.bfloat16)

        # attn logits = cat(emb, h) @ W_attn.T + b   (weights pre-split & pre-transposed)
        att = (
            jnp.dot(emb, w_attn_e_ref[...], preferred_element_type=jnp.float32)
            + jnp.dot(h16, w_attn_h_ref[...], preferred_element_type=jnp.float32)
            + b_attn_ref[...]                                 # padded cols carry -1e30
        )                                                     # (Bp, Lp) f32
        am = jnp.max(att, axis=1, keepdims=True)
        ae = jnp.exp(att - am)
        inv_den = pl.reciprocal(jnp.sum(ae, axis=1, keepdims=True), approx=True)
        attn_w = ae * inv_den                                 # (Bp, Lp)
        attn_ref[...] = attn_w

        # attn_applied[b, h] = sum_l attn_w[b, l] * enc[b, l, h]
        # Batched MXU contraction (flash-attention style), only over the real L range.
        attn_c = attn_w[:, :Lse].astype(jnp.bfloat16).reshape(Bp, 1, Lse)
        applied = jnp.einsum(
            "bql,blh->bqh", attn_c, enc_ref[...],
            preferred_element_type=jnp.float32,
        )[:, 0, :]                                            # (Bp, Hp) f32

        # attn_combine + ReLU
        x = (
            jnp.dot(emb, w_comb_e_ref[...], preferred_element_type=jnp.float32)
            + jnp.dot(applied.astype(jnp.bfloat16), w_comb_a_ref[...],
                      preferred_element_type=jnp.float32)
            + b_comb_ref[...]
        )
        x = jnp.maximum(x, 0.0).astype(jnp.bfloat16)          # (Bp, Hp)

        # GRU cell (PyTorch gate order [r, z, n]); slices are 128-aligned (Hp % 128 == 0)
        gi = jnp.dot(x, w_ih_ref[...], preferred_element_type=jnp.float32) + b_ih_ref[...]
        gh = jnp.dot(h16, w_hh_ref[...], preferred_element_type=jnp.float32) + b_hh_ref[...]
        r = jax.nn.sigmoid(gi[:, 0:Hp] + gh[:, 0:Hp])
        z = jax.nn.sigmoid(gi[:, Hp:2 * Hp] + gh[:, Hp:2 * Hp])
        n = jnp.tanh(gi[:, 2 * Hp:3 * Hp] + r * gh[:, 2 * Hp:3 * Hp])
        h_new = (1.0 - z) * n + z * h32                       # (Bp, Hp) f32

        hid_out_ref[...] = h_new
        h_sc[...] = h_new.astype(jnp.bfloat16)                # cached for all V tiles
        m_sc[...] = jnp.full(m_sc.shape, -jnp.inf, dtype=m_sc.dtype)
        l_sc[...] = jnp.zeros(l_sc.shape, dtype=l_sc.dtype)

    # ---------- output projection, tiled & pipelined over this core's V range ----------
    logits = (
        jnp.dot(h_sc[...], w_out_ref[...], preferred_element_type=jnp.float32)
        + b_out_ref[...]                                      # padded vocab cols: -1e30
    )                                                         # (Bp, TV) f32
    logits_ref[...] = logits

    # online log-sum-exp across this core's V tiles (all lanes of m_sc/l_sc hold the same value)
    t_max = jnp.max(logits, axis=1, keepdims=True)            # (Bp, 1)
    m_old = m_sc[...]
    m_new = jnp.maximum(m_old, t_max)
    l_sc[...] = (
        l_sc[...] * jnp.exp(m_old - m_new)
        + jnp.sum(jnp.exp(logits - m_new[:, 0:1]), axis=1, keepdims=True)
    )
    m_sc[...] = m_new

    @pl.when(v == pl.num_programs(1) - 1)
    def _epilogue():
        lse_ref[...] = m_sc[...] + jnp.log(l_sc[...])         # per-core partial LSE


# --------------------------------------------------------------------------------------
# Parameter preparation (runs once, outside the kernel)
# --------------------------------------------------------------------------------------
def prepare_params(raw, *, v_tile=2048, weight_dtype=jnp.bfloat16):
    """Pad / split / transpose PyTorch-layout params to lane-dense kernel layout."""
    emb_tbl = raw["embedding"]                 # (V, H)
    V, H = emb_tbl.shape
    L = raw["w_attn"].shape[0]

    Hp = _round_up(H, 128)
    Lp = _round_up(L, 128)                     # attention-logit lane padding
    Lse = _round_up(L, 8)                      # encoder-output sublane padding only
    TV = min(_round_up(v_tile, 256), _round_up(V, 256))   # multiple of 256 (MXU N dim)
    Vp = _round_up(V, 2 * TV)                  # 2 = TensorCore split of the vocab axis

    def pad2(x, rows, cols, fill=0.0):
        return jnp.pad(x, ((0, rows - x.shape[0]), (0, cols - x.shape[1])),
                       constant_values=fill)

    w_attn = raw["w_attn"]                     # (L, 2H)  PyTorch (out, in)
    w_comb = raw["w_comb"]                     # (H, 2H)

    def gru_w(w):                              # (3H, H) -> (Hp, 3Hp), per-gate transposed
        blocks = [pad2(w[g * H:(g + 1) * H, :].T, Hp, Hp) for g in range(3)]
        return jnp.concatenate(blocks, axis=1).astype(weight_dtype)

    def gru_b(b):                              # (1, 3H) -> (1, 3Hp)
        blocks = [pad2(b[:, g * H:(g + 1) * H], 1, Hp) for g in range(3)]
        return jnp.concatenate(blocks, axis=1).astype(jnp.float32)

    return {
        "dims": dict(H=H, L=L, V=V, Hp=Hp, Lp=Lp, Lse=Lse, Vp=Vp, TV=TV),
        "embedding": pad2(emb_tbl, V, Hp).astype(weight_dtype),             # (V, Hp)
        "w_attn_e": pad2(w_attn[:, :H].T, Hp, Lp).astype(weight_dtype),
        "w_attn_h": pad2(w_attn[:, H:].T, Hp, Lp).astype(weight_dtype),
        "b_attn": pad2(raw["b_attn"], 1, Lp, fill=_NEG_BIAS).astype(jnp.float32),
        "w_comb_e": pad2(w_comb[:, :H].T, Hp, Hp).astype(weight_dtype),
        "w_comb_a": pad2(w_comb[:, H:].T, Hp, Hp).astype(weight_dtype),
        "b_comb": pad2(raw["b_comb"], 1, Hp).astype(jnp.float32),
        "w_ih_t": gru_w(raw["w_ih"]),
        "b_ih": gru_b(raw["b_ih"]),
        "w_hh_t": gru_w(raw["w_hh"]),
        "b_hh": gru_b(raw["b_hh"]),
        # TODO(synk): int8 (v5e/v6e) / fp8-e4m3 (v7x) w_out_t with per-column scales
        #             (applied before the -1e30 bias) halves the dominant HBM stream.
        "w_out_t": pad2(raw["w_out"].T, Hp, Vp).astype(weight_dtype),       # (Hp, Vp)
        "b_out": pad2(raw["b_out"], 1, Vp, fill=_NEG_BIAS).astype(jnp.float32),
    }


# --------------------------------------------------------------------------------------
# Wrapper: one decoder step
# --------------------------------------------------------------------------------------
def attention_decoder_step(input_ids, hidden, encoder_outputs, prepared):
    """input_ids (B,) i32; hidden (1,B,H) f32; encoder_outputs (L,B,H) f32 (seq-first).
    Returns (log_probs (B,V), hidden (1,B,H), attn_weights (B,L))."""
    d = prepared["dims"]
    H, L, V = d["H"], d["L"], d["V"]
    Hp, Lp, Lse, Vp, TV = d["Hp"], d["Lp"], d["Lse"], d["Vp"], d["TV"]
    B = input_ids.shape[0]
    # TODO(synk): for multi-beam decode, batch beams into one call (Bp toward 128/256)
    #             instead of padding a tiny B to 8.
    Bp = _round_up(B, 8)
    nV2 = Vp // (2 * TV)          # V tiles per TensorCore

    # Embedding gather + dropout (eval mode -> identity) in XLA.
    # TODO(synk): training-mode dropout RNG not implemented (eval parity only).
    # TODO(synk): a full decode loop should keep the constant weights VMEM-resident across
    #             steps (fused multi-step call or cross-call DMA futures); today they are
    #             re-streamed from HBM on every call.
    embedded = jnp.take(prepared["embedding"], input_ids, axis=0)          # (B, Hp)
    emb = jnp.pad(embedded, ((0, Bp - B), (0, 0)))
    h0 = jnp.pad(hidden[0], ((0, Bp - B), (0, Hp - H))).astype(jnp.float32)
    enc = jnp.transpose(encoder_outputs, (1, 0, 2))                        # (B, L, H)
    enc = jnp.pad(enc, ((0, Bp - B), (0, Lse - L), (0, Hp - H))).astype(emb.dtype)

    def const(shape):
        return pl.BlockSpec(shape, lambda c, v: (0,) * len(shape))

    grid_spec = pltpu.PrefetchScalarGridSpec(
        num_scalar_prefetch=0,
        grid=(2, nV2),
        in_specs=[
            const((Bp, Hp)),                                    # embedded
            const((Bp, Hp)),                                    # hidden
            const((Bp, Lse, Hp)),                               # encoder outputs (L->8-pad)
            const((Hp, Lp)), const((Hp, Lp)), const((1, Lp)),   # attn W (split) / b
            const((Hp, Hp)), const((Hp, Hp)), const((1, Hp)),   # attn_combine W / b
            const((Hp, 3 * Hp)), const((1, 3 * Hp)),            # GRU W_ih / b_ih
            const((Hp, 3 * Hp)), const((1, 3 * Hp)),            # GRU W_hh / b_hh
            pl.BlockSpec((Hp, TV), lambda c, v: (0, c * nV2 + v)),  # w_out tile (streamed)
            pl.BlockSpec((1, TV), lambda c, v: (0, c * nV2 + v)),   # b_out tile
        ],
        out_specs=[
            pl.BlockSpec((Bp, TV), lambda c, v: (0, c * nV2 + v)),   # raw logits (tiled)
            pl.BlockSpec((None, Bp, 128), lambda c, v: (c, 0, 0)),   # per-core partial LSE
            pl.BlockSpec((None, Bp, Hp), lambda c, v: (c, 0, 0)),    # new hidden (per core)
            pl.BlockSpec((None, Bp, Lp), lambda c, v: (c, 0, 0)),    # attn weights (per core)
        ],
        scratch_shapes=[
            pltpu.VMEM((Bp, Hp), jnp.bfloat16),                 # cached h_new for V tiles
            pltpu.VMEM((Bp, 128), jnp.float32),                 # running max
            pltpu.VMEM((Bp, 128), jnp.float32),                 # running sum-exp
        ],
    )

    out_shapes = (
        jax.ShapeDtypeStruct((Bp, Vp), jnp.float32),
        jax.ShapeDtypeStruct((2, Bp, 128), jnp.float32),
        jax.ShapeDtypeStruct((2, Bp, Hp), jnp.float32),
        jax.ShapeDtypeStruct((2, Bp, Lp), jnp.float32),
    )

    logits, lse, hid_new, attn_w = pl.pallas_call(
        _decoder_kernel,
        out_shape=out_shapes,
        grid_spec=grid_spec,
        compiler_params=pltpu.CompilerParams(
            # Axis 0: vocab halves -> independent ("parallel", both TCs on v7x).
            # Axis 1: online LSE reduction reusing the per-core GRU result ("arbitrary").
            dimension_semantics=("parallel", "arbitrary"),
            # Budgeted for v7x's 64 MiB physical VMEM; working set at TV=2048 / Hp=512
            # is ~16 MiB with double-buffered constants.
            vmem_limit_bytes=48 * 1024 * 1024,
        ),
    )(
        emb, h0, enc,
        prepared["w_attn_e"], prepared["w_attn_h"], prepared["b_attn"],
        prepared["w_comb_e"], prepared["w_comb_a"], prepared["b_comb"],
        prepared["w_ih_t"], prepared["b_ih"],
        prepared["w_hh_t"], prepared["b_hh"],
        prepared["w_out_t"], prepared["b_out"],
    )

    # Combine the two per-core partial LSEs, then normalize (O(B*V) elementwise in XLA);
    # padded vocab columns hold exp(-1e30 - lse) == 0, so they never leak.
    lse_total = jnp.logaddexp(lse[0, :, :1], lse[1, :, :1])                # (Bp, 1)
    log_probs = (logits - lse_total)[:B, :V]
    new_hidden = hid_new[0, :B, :H][None, :, :]
    attn_weights = attn_w[0, :B, :L]
    return log_probs, new_hidden, attn_weights


# --------------------------------------------------------------------------------------
# Parameter init (PyTorch layout: Linear weights are (out_features, in_features))
# --------------------------------------------------------------------------------------
def init_params(key, hidden_size, output_size, max_length):
    H, V, L = hidden_size, output_size, max_length
    ks = jax.random.split(key, 12)

    def rnd(k, shape, scale=0.1):
        return (scale * jax.random.normal(k, shape)).astype(jnp.float32)

    return {
        "embedding": rnd(ks[0], (V, H)),
        "w_attn": rnd(ks[1], (L, 2 * H)),
        "b_attn": rnd(ks[2], (1, L)),
        "w_comb": rnd(ks[3], (H, 2 * H)),
        "b_comb": rnd(ks[4], (1, H)),
        "w_ih": rnd(ks[5], (3 * H, H)),
        "b_ih": rnd(ks[6], (1, 3 * H)),
        "w_hh": rnd(ks[7], (3 * H, H)),
        "b_hh": rnd(ks[8], (1, 3 * H)),
        "w_out": rnd(ks[9], (V, H)),
        "b_out": rnd(ks[10], (1, V)),
    }


# --------------------------------------------------------------------------------------
# Pure-JAX f32 reference (mirrors the PyTorch forward, dropout = identity)
# --------------------------------------------------------------------------------------
def reference_step(input_ids, hidden, encoder_outputs, raw):
    H = hidden.shape[-1]
    emb = raw["embedding"][input_ids]                                   # (B, H)
    h = hidden[0]                                                       # (B, H)
    att = jnp.concatenate([emb, h], axis=1) @ raw["w_attn"].T + raw["b_attn"]
    attn_w = jax.nn.softmax(att, axis=1)                                # (B, L)
    enc = jnp.transpose(encoder_outputs, (1, 0, 2))                     # (B, L, H)
    applied = jnp.einsum("bl,blh->bh", attn_w, enc)
    x = jnp.concatenate([emb, applied], axis=1) @ raw["w_comb"].T + raw["b_comb"]
    x = jax.nn.relu(x)
    gi = x @ raw["w_ih"].T + raw["b_ih"]
    gh = h @ raw["w_hh"].T + raw["b_hh"]
    r = jax.nn.sigmoid(gi[:, :H] + gh[:, :H])
    z = jax.nn.sigmoid(gi[:, H:2 * H] + gh[:, H:2 * H])
    n = jnp.tanh(gi[:, 2 * H:] + r * gh[:, 2 * H:])
    h_new = (1.0 - z) * n + z * h
    logits = h_new @ raw["w_out"].T + raw["b_out"]
    return jax.nn.log_softmax(logits, axis=1), h_new[None], attn_w


if __name__ == "__main__":
    B, H, V, L = 2, 32, 16, 8   # batch, hidden_size, output_size (vocab), max_length

    key = jax.random.PRNGKey(0)
    k_par, k_in, k_hid, k_enc = jax.random.split(key, 4)

    raw_params = init_params(k_par, H, V, L)
    prepared = prepare_params(raw_params)

    input_ids = jax.random.randint(k_in, (B,), 0, V, dtype=jnp.int32)
    hidden = (0.1 * jax.random.normal(k_hid, (1, B, H))).astype(jnp.float32)
    encoder_outputs = (0.1 * jax.random.normal(k_enc, (L, B, H))).astype(jnp.float32)

    log_probs, new_hidden, attn_weights = attention_decoder_step(
        input_ids, hidden, encoder_outputs, prepared
    )
    jax.block_until_ready((log_probs, new_hidden, attn_weights))

    assert log_probs.shape == (B, V)
    assert new_hidden.shape == (1, B, H)
    assert attn_weights.shape == (B, L)
    # sanity: attention rows sum to 1; log-probs exponentiate to a distribution
    assert jnp.allclose(jnp.sum(attn_weights, axis=1), 1.0, atol=1e-2)
    assert jnp.allclose(jnp.sum(jnp.exp(log_probs), axis=1), 1.0, atol=1e-3)

    # compare against the f32 reference (bf16 weight casts -> loose tolerance)
    ref_lp, ref_h, ref_aw = reference_step(input_ids, hidden, encoder_outputs, raw_params)
    assert jnp.allclose(log_probs, ref_lp, atol=2e-2)
    assert jnp.allclose(new_hidden, ref_h, atol=2e-2)
    assert jnp.allclose(attn_weights, ref_aw, atol=2e-2)
    print("KERNEL_OK")
</pallas_src>

<mosaic_0001>
module attributes {stable_mosaic.version = 11 : i64} {
  func.func @_decoder_kernel(%arg0: i32, %arg1: i32, %arg2: memref<8x128xbf16, #tpu.memory_space<vmem>>, %arg3: memref<8x128xf32, #tpu.memory_space<vmem>>, %arg4: memref<8x8x128xbf16, #tpu.memory_space<vmem>>, %arg5: memref<128x128xbf16, #tpu.memory_space<vmem>>, %arg6: memref<128x128xbf16, #tpu.memory_space<vmem>>, %arg7: memref<1x128xf32, #tpu.memory_space<vmem>>, %arg8: memref<128x128xbf16, #tpu.memory_space<vmem>>, %arg9: memref<128x128xbf16, #tpu.memory_space<vmem>>, %arg10: memref<1x128xf32, #tpu.memory_space<vmem>>, %arg11: memref<128x384xbf16, #tpu.memory_space<vmem>>, %arg12: memref<1x384xf32, #tpu.memory_space<vmem>>, %arg13: memref<128x384xbf16, #tpu.memory_space<vmem>>, %arg14: memref<1x384xf32, #tpu.memory_space<vmem>>, %arg15: memref<128x256xbf16, #tpu.memory_space<vmem>>, %arg16: memref<1x256xf32, #tpu.memory_space<vmem>>, %arg17: memref<8x256xf32, #tpu.memory_space<vmem>>, %arg18: memref<1x8x128xf32, #tpu.memory_space<vmem>>, %arg19: memref<1x8x128xf32, #tpu.memory_space<vmem>>, %arg20: memref<1x8x128xf32, #tpu.memory_space<vmem>>, %arg21: memref<8x128xbf16, #tpu.memory_space<vmem>>, %arg22: memref<8x128xf32, #tpu.memory_space<vmem>>, %arg23: memref<8x128xf32, #tpu.memory_space<vmem>>) attributes {dimension_semantics = [#tpu.dimension_semantics<parallel>, #tpu.dimension_semantics<arbitrary>], iteration_bounds = array<i64: 2, 1>, scalar_prefetch = 0 : i64, scratch_operands = 3 : i64, tpu.core_type = #tpu.core_type<tc>, window_params = [{pipeline_mode = #tpu.pipeline_mode<synchronous>, transform_indices = @transform_0, window_bounds = array<i64: 8, 128>}, {pipeline_mode = #tpu.pipeline_mode<synchronous>, transform_indices = @transform_1, window_bounds = array<i64: 8, 128>}, {pipeline_mode = #tpu.pipeline_mode<synchronous>, transform_indices = @transform_2, window_bounds = array<i64: 8, 8, 128>}, {pipeline_mode = #tpu.pipeline_mode<synchronous>, transform_indices = @transform_3, window_bounds = array<i64: 128, 128>}, {pipeline_mode = #tpu.pipeline_mode<synchronous>, transform_indices = @transform_4, window_bounds = array<i64: 128, 128>}, {pipeline_mode = #tpu.pipeline_mode<synchronous>, transform_indices = @transform_5, window_bounds = array<i64: 1, 128>}, {pipeline_mode = #tpu.pipeline_mode<synchronous>, transform_indices = @transform_6, window_bounds = array<i64: 128, 128>}, {pipeline_mode = #tpu.pipeline_mode<synchronous>, transform_indices = @transform_7, window_bounds = array<i64: 128, 128>}, {pipeline_mode = #tpu.pipeline_mode<synchronous>, transform_indices = @transform_8, window_bounds = array<i64: 1, 128>}, {pipeline_mode = #tpu.pipeline_mode<synchronous>, transform_indices = @transform_9, window_bounds = array<i64: 128, 384>}, {pipeline_mode = #tpu.pipeline_mode<synchronous>, transform_indices = @transform_10, window_bounds = array<i64: 1, 384>}, {pipeline_mode = #tpu.pipeline_mode<synchronous>, transform_indices = @transform_11, window_bounds = array<i64: 128, 384>}, {pipeline_mode = #tpu.pipeline_mode<synchronous>, transform_indices = @transform_12, window_bounds = array<i64: 1, 384>}, {transform_indices = @transform_13, window_bounds = array<i64: 128, 256>}, {transform_indices = @transform_14, window_bounds = array<i64: 1, 256>}, {transform_indices = @transform_15, window_bounds = array<i64: 8, 256>}, {transform_indices = @transform_16, window_bounds = array<i64: 1, 8, 128>}, {transform_indices = @transform_17, window_bounds = array<i64: 1, 8, 128>}, {transform_indices = @transform_18, window_bounds = array<i64: 1, 8, 128>}]} {
    %c0_i32 = arith.constant 0 : i32
    %0 = arith.cmpi eq, %arg1, %c0_i32 : i32
    %1 = arith.extui %0 : i1 to i32
    %c0_i32_0 = arith.constant 0 : i32
    %2 = arith.cmpi ne, %1, %c0_i32_0 : i32
    scf.if %2 {
      %c0_20 = arith.constant 0 : index
      %c0_21 = arith.constant 0 : index
      %32 = vector.load %arg2[%c0_20, %c0_21] : memref<8x128xbf16, #tpu.memory_space<vmem>>, vector<8x128xbf16>
      %c0_22 = arith.constant 0 : index
      %c0_23 = arith.constant 0 : index
      %33 = vector.load %arg3[%c0_22, %c0_23] : memref<8x128xf32, #tpu.memory_space<vmem>>, vector<8x128xf32>
      %34 = arith.truncf %33 : vector<8x128xf32> to vector<8x128xbf16>
      %c0_24 = arith.constant 0 : index
      %c0_25 = arith.constant 0 : index
      %35 = vector.load %arg5[%c0_24, %c0_25] : memref<128x128xbf16, #tpu.memory_space<vmem>>, vector<128x128xbf16>
      %cst_26 = arith.constant dense<0.000000e+00> : vector<8x128xf32>
      %36 = tpu.matmul %32, %35, %cst_26 {dimension_numbers = #tpu.dot_dimension_numbers<[1], [0], [0], [1], [0, 0, 1, 1], [], []>} : vector<8x128xbf16>, vector<128x128xbf16>, vector<8x128xf32> -> vector<8x128xf32>
      %c0_27 = arith.constant 0 : index
      %c0_28 = arith.constant 0 : index
      %37 = vector.load %arg6[%c0_27, %c0_28] : memref<128x128xbf16, #tpu.memory_space<vmem>>, vector<128x128xbf16>
      %cst_29 = arith.constant dense<0.000000e+00> : vector<8x128xf32>
      %38 = tpu.matmul %34, %37, %cst_29 {dimension_numbers = #tpu.dot_dimension_numbers<[1], [0], [0], [1], [0, 0, 1, 1], [], []>} : vector<8x128xbf16>, vector<128x128xbf16>, vector<8x128xf32> -> vector<8x128xf32>
      %39 = arith.addf %36, %38 : vector<8x128xf32>
      %c0_30 = arith.constant 0 : index
      %c0_31 = arith.constant 0 : index
      %40 = vector.load %arg7[%c0_30, %c0_31] : memref<1x128xf32, #tpu.memory_space<vmem>>, vector<1x128xf32>
      %41 = vector.broadcast %40 : vector<1x128xf32> to vector<8x128xf32>
      %42 = arith.addf %39, %41 : vector<8x128xf32>
      %cst_32 = arith.constant dense<0xFF800000> : vector<8xf32>
      %43 = vector.multi_reduction <maximumf>, %42, %cst_32 [1] : vector<8x128xf32> to vector<8xf32>
      %44 = vector.shape_cast %43 : vector<8xf32> to vector<8x1xf32>
      %45 = vector.broadcast %44 : vector<8x1xf32> to vector<8x128xf32>
      %46 = arith.subf %42, %45 : vector<8x128xf32>
      %47 = math.exp %46 : vector<8x128xf32>
      %cst_33 = arith.constant dense<0.000000e+00> : vector<8xf32>
      %48 = vector.multi_reduction <add>, %47, %cst_33 [1] : vector<8x128xf32> to vector<8xf32>
      %49 = vector.shape_cast %48 : vector<8xf32> to vector<8x1xf32>
      %50 = tpu.reciprocal %49 {approx = true} : vector<8x1xf32> -> vector<8x1xf32>
      %51 = vector.broadcast %50 : vector<8x1xf32> to vector<8x128xf32>
      %52 = arith.mulf %47, %51 : vector<8x128xf32>
      %c0_34 = arith.constant 0 : index
      %c0_35 = arith.constant 0 : index
      %c0_36 = arith.constant 0 : index
      %53 = vector.load %arg20[%c0_34, %c0_35, %c0_36] : memref<1x8x128xf32, #tpu.memory_space<vmem>>, vector<1x8x128xf32>
      %54 = vector.shape_cast %53 : vector<1x8x128xf32> to vector<8x128xf32>
      %55 = vector.shape_cast %52 : vector<8x128xf32> to vector<1x8x128xf32>
      tpu.vector_store %arg20[%c0_34, %c0_35, %c0_36], %55 {strides = array<i32>} : memref<1x8x128xf32, #tpu.memory_space<vmem>>, vector<1x8x128xf32>,
      %56 = vector.extract_strided_slice %52 {offsets = [0, 0], sizes = [8, 8], strides = [1, 1]} : vector<8x128xf32> to vector<8x8xf32>
      %57 = arith.truncf %56 : vector<8x8xf32> to vector<8x8xbf16>
      %58 = vector.shape_cast %57 : vector<8x8xbf16> to vector<8x1x8xbf16>
      %c0_37 = arith.constant 0 : index
      %c0_38 = arith.constant 0 : index
      %c0_39 = arith.constant 0 : index
      %59 = vector.load %arg4[%c0_37, %c0_38, %c0_39] : memref<8x8x128xbf16, #tpu.memory_space<vmem>>, vector<8x8x128xbf16>
      "tpu.trace_start"() <{level = 10 : i32, message = "bql,blh->bqh"}> : () -> ()
      %cst_40 = arith.constant dense<0.000000e+00> : vector<8x1x128xf32>
      %60 = tpu.matmul %58, %59, %cst_40 {dimension_numbers = #tpu.dot_dimension_numbers<[2], [1], [1], [2], [0, 0, 0, 1, 1, 2], [0], [0]>} : vector<8x1x8xbf16>, vector<8x8x128xbf16>, vector<8x1x128xf32> -> vector<8x1x128xf32>
      "tpu.trace_stop"() : () -> ()
      %61 = vector.shape_cast %60 : vector<8x1x128xf32> to vector<8x128xf32>
      %c0_41 = arith.constant 0 : index
      %c0_42 = arith.constant 0 : index
      %62 = vector.load %arg8[%c0_41, %c0_42] : memref<128x128xbf16, #tpu.memory_space<vmem>>, vector<128x128xbf16>
      %cst_43 = arith.constant dense<0.000000e+00> : vector<8x128xf32>
      %63 = tpu.matmul %32, %62, %cst_43 {dimension_numbers = #tpu.dot_dimension_numbers<[1], [0], [0], [1], [0, 0, 1, 1], [], []>} : vector<8x128xbf16>, vector<128x128xbf16>, vector<8x128xf32> -> vector<8x128xf32>
      %64 = arith.truncf %61 : vector<8x128xf32> to vector<8x128xbf16>
      %c0_44 = arith.constant 0 : index
      %c0_45 = arith.constant 0 : index
      %65 = vector.load %arg9[%c0_44, %c0_45] : memref<128x128xbf16, #tpu.memory_space<vmem>>, vector<128x128xbf16>
      %cst_46 = arith.constant dense<0.000000e+00> : vector<8x128xf32>
      %66 = tpu.matmul %64, %65, %cst_46 {dimension_numbers = #tpu.dot_dimension_numbers<[1], [0], [0], [1], [0, 0, 1, 1], [], []>} : vector<8x128xbf16>, vector<128x128xbf16>, vector<8x128xf32> -> vector<8x128xf32>
      %67 = arith.addf %63, %66 : vector<8x128xf32>
      %c0_47 = arith.constant 0 : index
      %c0_48 = arith.constant 0 : index
      %68 = vector.load %arg10[%c0_47, %c0_48] : memref<1x128xf32, #tpu.memory_space<vmem>>, vector<1x128xf32>
      %69 = vector.broadcast %68 : vector<1x128xf32> to vector<8x128xf32>
      %70 = arith.addf %67, %69 : vector<8x128xf32>
      %cst_49 = arith.constant 0.000000e+00 : f32
      %71 = vector.broadcast %cst_49 : f32 to vector<8x128xf32>
      %72 = arith.maximumf %70, %71 : vector<8x128xf32>
      %73 = arith.truncf %72 : vector<8x128xf32> to vector<8x128xbf16>
      %c0_50 = arith.constant 0 : index
      %c0_51 = arith.constant 0 : index
      %74 = vector.load %arg11[%c0_50, %c0_51] : memref<128x384xbf16, #tpu.memory_space<vmem>>, vector<128x384xbf16>
      %cst_52 = arith.constant dense<0.000000e+00> : vector<8x384xf32>
      %75 = tpu.matmul %73, %74, %cst_52 {dimension_numbers = #tpu.dot_dimension_numbers<[1], [0], [0], [1], [0, 0, 1, 1], [], []>} : vector<8x128xbf16>, vector<128x384xbf16>, vector<8x384xf32> -> vector<8x384xf32>
      %c0_53 = arith.constant 0 : index
      %c0_54 = arith.constant 0 : index
      %76 = vector.load %arg12[%c0_53, %c0_54] : memref<1x384xf32, #tpu.memory_space<vmem>>, vector<1x384xf32>
      %77 = vector.broadcast %76 : vector<1x384xf32> to vector<8x384xf32>
      %78 = arith.addf %75, %77 : vector<8x384xf32>
      %c0_55 = arith.constant 0 : index
      %c0_56 = arith.constant 0 : index
      %79 = vector.load %arg13[%c0_55, %c0_56] : memref<128x384xbf16, #tpu.memory_space<vmem>>, vector<128x384xbf16>
      %cst_57 = arith.constant dense<0.000000e+00> : vector<8x384xf32>
      %80 = tpu.matmul %34, %79, %cst_57 {dimension_numbers = #tpu.dot_dimension_numbers<[1], [0], [0], [1], [0, 0, 1, 1], [], []>} : vector<8x128xbf16>, vector<128x384xbf16>, vector<8x384xf32> -> vector<8x384xf32>
      %c0_58 = arith.constant 0 : index
      %c0_59 = arith.constant 0 : index
      %81 = vector.load %arg14[%c0_58, %c0_59] : memref<1x384xf32, #tpu.memory_space<vmem>>, vector<1x384xf32>
      %82 = vector.broadcast %81 : vector<1x384xf32> to vector<8x384xf32>
      %83 = arith.addf %80, %82 : vector<8x384xf32>
      %84 = vector.extract_strided_slice %78 {offsets = [0, 0], sizes = [8, 128], strides = [1, 1]} : vector<8x384xf32> to vector<8x128xf32>
      %85 = vector.extract_strided_slice %83 {offsets = [0, 0], sizes = [8, 128], strides = [1, 1]} : vector<8x384xf32> to vector<8x128xf32>
      %86 = arith.addf %84, %85 : vector<8x128xf32>
      %87 = arith.negf %86 : vector<8x128xf32>
      %88 = math.exp %87 : vector<8x128xf32>
      %cst_60 = arith.constant 1.000000e+00 : f32
      %89 = vector.broadcast %cst_60 : f32 to vector<8x128xf32>
      %90 = arith.addf %89, %88 : vector<8x128xf32>
      %91 = arith.divf %89, %90 : vector<8x128xf32>
      %92 = vector.extract_strided_slice %78 {offsets = [0, 128], sizes = [8, 128], strides = [1, 1]} : vector<8x384xf32> to vector<8x128xf32>
      %93 = vector.extract_strided_slice %83 {offsets = [0, 128], sizes = [8, 128], strides = [1, 1]} : vector<8x384xf32> to vector<8x128xf32>
      %94 = arith.addf %92, %93 : vector<8x128xf32>
      %95 = arith.negf %94 : vector<8x128xf32>
      %96 = math.exp %95 : vector<8x128xf32>
      %cst_61 = arith.constant 1.000000e+00 : f32
      %97 = vector.broadcast %cst_61 : f32 to vector<8x128xf32>
      %98 = arith.addf %97, %96 : vector<8x128xf32>
      %99 = arith.divf %97, %98 : vector<8x128xf32>
      %100 = vector.extract_strided_slice %78 {offsets = [0, 256], sizes = [8, 128], strides = [1, 1]} : vector<8x384xf32> to vector<8x128xf32>
      %101 = vector.extract_strided_slice %83 {offsets = [0, 256], sizes = [8, 128], strides = [1, 1]} : vector<8x384xf32> to vector<8x128xf32>
      %102 = arith.mulf %91, %101 : vector<8x128xf32>
      %103 = arith.addf %100, %102 : vector<8x128xf32>
      %104 = math.tanh %103 : vector<8x128xf32>
      %cst_62 = arith.constant 1.000000e+00 : f32
      %105 = vector.broadcast %cst_62 : f32 to vector<8x128xf32>
      %106 = arith.subf %105, %99 : vector<8x128xf32>
      %107 = arith.mulf %106, %104 : vector<8x128xf32>
      %108 = arith.mulf %99, %33 : vector<8x128xf32>
      %109 = arith.addf %107, %108 : vector<8x128xf32>
      %c0_63 = arith.constant 0 : index
      %c0_64 = arith.constant 0 : index
      %c0_65 = arith.constant 0 : index
      %110 = vector.load %arg19[%c0_63, %c0_64, %c0_65] : memref<1x8x128xf32, #tpu.memory_space<vmem>>, vector<1x8x128xf32>
      %111 = vector.shape_cast %110 : vector<1x8x128xf32> to vector<8x128xf32>
      %112 = vector.shape_cast %109 : vector<8x128xf32> to vector<1x8x128xf32>
      tpu.vector_store %arg19[%c0_63, %c0_64, %c0_65], %112 {strides = array<i32>} : memref<1x8x128xf32, #tpu.memory_space<vmem>>, vector<1x8x128xf32>,
      %113 = arith.truncf %109 : vector<8x128xf32> to vector<8x128xbf16>
      %c0_66 = arith.constant 0 : index
      %c0_67 = arith.constant 0 : index
      %114 = vector.load %arg21[%c0_66, %c0_67] : memref<8x128xbf16, #tpu.memory_space<vmem>>, vector<8x128xbf16>
      tpu.vector_store %arg21[%c0_66, %c0_67], %113 {strides = array<i32>} : memref<8x128xbf16, #tpu.memory_space<vmem>>, vector<8x128xbf16>,
      %cst_68 = arith.constant 0xFF800000 : f32
      %115 = vector.broadcast %cst_68 : f32 to vector<8x128xf32>
      %c0_69 = arith.constant 0 : index
      %c0_70 = arith.constant 0 : index
      %116 = vector.load %arg22[%c0_69, %c0_70] : memref<8x128xf32, #tpu.memory_space<vmem>>, vector<8x128xf32>
      tpu.vector_store %arg22[%c0_69, %c0_70], %115 {strides = array<i32>} : memref<8x128xf32, #tpu.memory_space<vmem>>, vector<8x128xf32>,
      %cst_71 = arith.constant 0.000000e+00 : f32
      %117 = vector.broadcast %cst_71 : f32 to vector<8x128xf32>
      %c0_72 = arith.constant 0 : index
      %c0_73 = arith.constant 0 : index
      %118 = vector.load %arg23[%c0_72, %c0_73] : memref<8x128xf32, #tpu.memory_space<vmem>>, vector<8x128xf32>
      tpu.vector_store %arg23[%c0_72, %c0_73], %117 {strides = array<i32>} : memref<8x128xf32, #tpu.memory_space<vmem>>, vector<8x128xf32>,
    } else {
    }
    %c0 = arith.constant 0 : index
    %c0_1 = arith.constant 0 : index
    %3 = vector.load %arg21[%c0, %c0_1] : memref<8x128xbf16, #tpu.memory_space<vmem>>, vector<8x128xbf16>
    %c0_2 = arith.constant 0 : index
    %c0_3 = arith.constant 0 : index
    %4 = vector.load %arg15[%c0_2, %c0_3] : memref<128x256xbf16, #tpu.memory_space<vmem>>, vector<128x256xbf16>
    %cst = arith.constant dense<0.000000e+00> : vector<8x256xf32>
    %5 = tpu.matmul %3, %4, %cst {dimension_numbers = #tpu.dot_dimension_numbers<[1], [0], [0], [1], [0, 0, 1, 1], [], []>} : vector<8x128xbf16>, vector<128x256xbf16>, vector<8x256xf32> -> vector<8x256xf32>
    %c0_4 = arith.constant 0 : index
    %c0_5 = arith.constant 0 : index
    %6 = vector.load %arg16[%c0_4, %c0_5] : memref<1x256xf32, #tpu.memory_space<vmem>>, vector<1x256xf32>
    %7 = vector.broadcast %6 : vector<1x256xf32> to vector<8x256xf32>
    %8 = arith.addf %5, %7 : vector<8x256xf32>
    %c0_6 = arith.constant 0 : index
    %c0_7 = arith.constant 0 : index
    %9 = vector.load %arg17[%c0_6, %c0_7] : memref<8x256xf32, #tpu.memory_space<vmem>>, vector<8x256xf32>
    tpu.vector_store %arg17[%c0_6, %c0_7], %8 {strides = array<i32>} : memref<8x256xf32, #tpu.memory_space<vmem>>, vector<8x256xf32>,
    %cst_8 = arith.constant dense<0xFF800000> : vector<8xf32>
    %10 = vector.multi_reduction <maximumf>, %8, %cst_8 [1] : vector<8x256xf32> to vector<8xf32>
    %11 = vector.shape_cast %10 : vector<8xf32> to vector<8x1xf32>
    %c0_9 = arith.constant 0 : index
    %c0_10 = arith.constant 0 : index
    %12 = vector.load %arg22[%c0_9, %c0_10] : memref<8x128xf32, #tpu.memory_space<vmem>>, vector<8x128xf32>
    %13 = vector.broadcast %11 : vector<8x1xf32> to vector<8x128xf32>
    %14 = arith.maximumf %12, %13 : vector<8x128xf32>
    %c0_11 = arith.constant 0 : index
    %c0_12 = arith.constant 0 : index
    %15 = vector.load %arg23[%c0_11, %c0_12] : memref<8x128xf32, #tpu.memory_space<vmem>>, vector<8x128xf32>
    %16 = arith.subf %12, %14 : vector<8x128xf32>
    %17 = math.exp %16 : vector<8x128xf32>
    %18 = arith.mulf %15, %17 : vector<8x128xf32>
    %19 = vector.extract_strided_slice %14 {offsets = [0, 0], sizes = [8, 1], strides = [1, 1]} : vector<8x128xf32> to vector<8x1xf32>
    %20 = vector.broadcast %19 : vector<8x1xf32> to vector<8x256xf32>
    %21 = arith.subf %8, %20 : vector<8x256xf32>
    %22 = math.exp %21 : vector<8x256xf32>
    %cst_13 = arith.constant dense<0.000000e+00> : vector<8xf32>
    %23 = vector.multi_reduction <add>, %22, %cst_13 [1] : vector<8x256xf32> to vector<8xf32>
    %24 = vector.shape_cast %23 : vector<8xf32> to vector<8x1xf32>
    %25 = vector.broadcast %24 : vector<8x1xf32> to vector<8x128xf32>
    %26 = arith.addf %18, %25 : vector<8x128xf32>
    %c0_14 = arith.constant 0 : index
    %c0_15 = arith.constant 0 : index
    %27 = vector.load %arg23[%c0_14, %c0_15] : memref<8x128xf32, #tpu.memory_space<vmem>>, vector<8x128xf32>
    tpu.vector_store %arg23[%c0_14, %c0_15], %26 {strides = array<i32>} : memref<8x128xf32, #tpu.memory_space<vmem>>, vector<8x128xf32>,
    %c0_16 = arith.constant 0 : index
    %c0_17 = arith.constant 0 : index
    %28 = vector.load %arg22[%c0_16, %c0_17] : memref<8x128xf32, #tpu.memory_space<vmem>>, vector<8x128xf32>
    tpu.vector_store %arg22[%c0_16, %c0_17], %14 {strides = array<i32>} : memref<8x128xf32, #tpu.memory_space<vmem>>, vector<8x128xf32>,
    %c0_i32_18 = arith.constant 0 : i32
    %29 = arith.cmpi eq, %arg1, %c0_i32_18 : i32
    %30 = arith.extui %29 : i1 to i32
    %c0_i32_19 = arith.constant 0 : i32
    %31 = arith.cmpi ne, %30, %c0_i32_19 : i32
    scf.if %31 {
      %c0_20 = arith.constant 0 : index
      %c0_21 = arith.constant 0 : index
      %32 = vector.load %arg22[%c0_20, %c0_21] : memref<8x128xf32, #tpu.memory_space<vmem>>, vector<8x128xf32>
      %c0_22 = arith.constant 0 : index
      %c0_23 = arith.constant 0 : index
      %33 = vector.load %arg23[%c0_22, %c0_23] : memref<8x128xf32, #tpu.memory_space<vmem>>, vector<8x128xf32>
      %34 = math.log %33 : vector<8x128xf32>
      %35 = arith.addf %32, %34 : vector<8x128xf32>
      %c0_24 = arith.constant 0 : index
      %c0_25 = arith.constant 0 : index
      %c0_26 = arith.constant 0 : index
      %36 = vector.load %arg18[%c0_24, %c0_25, %c0_26] : memref<1x8x128xf32, #tpu.memory_space<vmem>>, vector<1x8x128xf32>
      %37 = vector.shape_cast %36 : vector<1x8x128xf32> to vector<8x128xf32>
      %38 = vector.shape_cast %35 : vector<8x128xf32> to vector<1x8x128xf32>
      tpu.vector_store %arg18[%c0_24, %c0_25, %c0_26], %38 {strides = array<i32>} : memref<1x8x128xf32, #tpu.memory_space<vmem>>, vector<1x8x128xf32>,
    } else {
    }
    return
  }
  func.func @transform_0(%arg0: i32, %arg1: i32) -> (i32, i32) {
    %c0_i32 = arith.constant 0 : i32
    %c0_i32_0 = arith.constant 0 : i32
    %c0_i32_1 = arith.constant 0 : i32
    return %c0_i32, %c0_i32_0 : i32, i32
  }
  func.func @transform_1(%arg0: i32, %arg1: i32) -> (i32, i32) {
    %c0_i32 = arith.constant 0 : i32
    %c0_i32_0 = arith.constant 0 : i32
    %c0_i32_1 = arith.constant 0 : i32
    return %c0_i32, %c0_i32_0 : i32, i32
  }
  func.func @transform_2(%arg0: i32, %arg1: i32) -> (i32, i32, i32) {
    %c0_i32 = arith.constant 0 : i32
    %c0_i32_0 = arith.constant 0 : i32
    %c0_i32_1 = arith.constant 0 : i32
    %c0_i32_2 = arith.constant 0 : i32
    return %c0_i32, %c0_i32_0, %c0_i32_1 : i32, i32, i32
  }
  func.func @transform_3(%arg0: i32, %arg1: i32) -> (i32, i32) {
    %c0_i32 = arith.constant 0 : i32
    %c0_i32_0 = arith.constant 0 : i32
    %c0_i32_1 = arith.constant 0 : i32
    return %c0_i32, %c0_i32_0 : i32, i32
  }
  func.func @transform_4(%arg0: i32, %arg1: i32) -> (i32, i32) {
    %c0_i32 = arith.constant 0 : i32
    %c0_i32_0 = arith.constant 0 : i32
    %c0_i32_1 = arith.constant 0 : i32
    return %c0_i32, %c0_i32_0 : i32, i32
  }
  func.func @transform_5(%arg0: i32, %arg1: i32) -> (i32, i32) {
    %c0_i32 = arith.constant 0 : i32
    %c0_i32_0 = arith.constant 0 : i32
    %c0_i32_1 = arith.constant 0 : i32
    return %c0_i32, %c0_i32_0 : i32, i32
  }
  func.func @transform_6(%arg0: i32, %arg1: i32) -> (i32, i32) {
    %c0_i32 = arith.constant 0 : i32
    %c0_i32_0 = arith.constant 0 : i32
    %c0_i32_1 = arith.constant 0 : i32
    return %c0_i32, %c0_i32_0 : i32, i32
  }
  func.func @transform_7(%arg0: i32, %arg1: i32) -> (i32, i32) {
    %c0_i32 = arith.constant 0 : i32
    %c0_i32_0 = arith.constant 0 : i32
    %c0_i32_1 = arith.constant 0 : i32
    return %c0_i32, %c0_i32_0 : i32, i32
  }
  func.func @transform_8(%arg0: i32, %arg1: i32) -> (i32, i32) {
    %c0_i32 = arith.constant 0 : i32
    %c0_i32_0 = arith.constant 0 : i32
    %c0_i32_1 = arith.constant 0 : i32
    return %c0_i32, %c0_i32_0 : i32, i32
  }
  func.func @transform_9(%arg0: i32, %arg1: i32) -> (i32, i32) {
    %c0_i32 = arith.constant 0 : i32
    %c0_i32_0 = arith.constant 0 : i32
    %c0_i32_1 = arith.constant 0 : i32
    return %c0_i32, %c0_i32_0 : i32, i32
  }
  func.func @transform_10(%arg0: i32, %arg1: i32) -> (i32, i32) {
    %c0_i32 = arith.constant 0 : i32
    %c0_i32_0 = arith.constant 0 : i32
    %c0_i32_1 = arith.constant 0 : i32
    return %c0_i32, %c0_i32_0 : i32, i32
  }
  func.func @transform_11(%arg0: i32, %arg1: i32) -> (i32, i32) {
    %c0_i32 = arith.constant 0 : i32
    %c0_i32_0 = arith.constant 0 : i32
    %c0_i32_1 = arith.constant 0 : i32
    return %c0_i32, %c0_i32_0 : i32, i32
  }
  func.func @transform_12(%arg0: i32, %arg1: i32) -> (i32, i32) {
    %c0_i32 = arith.constant 0 : i32
    %c0_i32_0 = arith.constant 0 : i32
    %c0_i32_1 = arith.constant 0 : i32
    return %c0_i32, %c0_i32_0 : i32, i32
  }
  func.func @transform_13(%arg0: i32, %arg1: i32) -> (i32, i32) {
    %c1_i32 = arith.constant 1 : i32
    %0 = arith.muli %arg0, %c1_i32 : i32
    %1 = arith.addi %0, %arg1 : i32
    %c0_i32 = arith.constant 0 : i32
    %c0_i32_0 = arith.constant 0 : i32
    return %c0_i32, %1 : i32, i32
  }
  func.func @transform_14(%arg0: i32, %arg1: i32) -> (i32, i32) {
    %c1_i32 = arith.constant 1 : i32
    %0 = arith.muli %arg0, %c1_i32 : i32
    %1 = arith.addi %0, %arg1 : i32
    %c0_i32 = arith.constant 0 : i32
    %c0_i32_0 = arith.constant 0 : i32
    return %c0_i32, %1 : i32, i32
  }
  func.func @transform_15(%arg0: i32, %arg1: i32) -> (i32, i32) {
    %c1_i32 = arith.constant 1 : i32
    %0 = arith.muli %arg0, %c1_i32 : i32
    %1 = arith.addi %0, %arg1 : i32
    %c0_i32 = arith.constant 0 : i32
    %c0_i32_0 = arith.constant 0 : i32
    return %c0_i32, %1 : i32, i32
  }
  func.func @transform_16(%arg0: i32, %arg1: i32) -> (i32, i32, i32) {
    %c0_i32 = arith.constant 0 : i32
    %c0_i32_0 = arith.constant 0 : i32
    %c0_i32_1 = arith.constant 0 : i32
    return %arg0, %c0_i32, %c0_i32_0 : i32, i32, i32
  }
  func.func @transform_17(%arg0: i32, %arg1: i32) -> (i32, i32, i32) {
    %c0_i32 = arith.constant 0 : i32
    %c0_i32_0 = arith.constant 0 : i32
    %c0_i32_1 = arith.constant 0 : i32
    return %arg0, %c0_i32, %c0_i32_0 : i32, i32, i32
  }
  func.func @transform_18(%arg0: i32, %arg1: i32) -> (i32, i32, i32) {
    %c0_i32 = arith.constant 0 : i32
    %c0_i32_0 = arith.constant 0 : i32
    %c0_i32_1 = arith.constant 0 : i32
    return %arg0, %c0_i32, %c0_i32_0 : i32, i32, i32
  }
}

</mosaic_0001>

<bundles_post_ra>
// kernel: tpu_custom_call.1
= control target key start
LH: loop header
LB: loop body
LE: loop exit
PB: predicated region body
PF: predicated region fallthrough
CT: control target
= control target key end

     0   :  { %s4709_s0 = inlined_call_operand.hbm [shape: bf16[8,128], index: 0, kind: input, shape index: {}]   ;;  %s4710_s1 = inlined_call_operand.hbm [shape: f32[8,128], index: 1, kind: input, shape index: {}]   ;;  %s4711_s2 = inlined_call_operand.hbm [shape: bf16[8,8,128], index: 2, kind: input, shape index: {}]   ;;  %s4712_s3 = inlined_call_operand.hbm [shape: bf16[128,128], index: 3, kind: input, shape index: {}]   ;;  %s4713_s4 = inlined_call_operand.hbm [shape: bf16[128,128], index: 4, kind: input, shape index: {}]   ;;  %s4714_s5 = inlined_call_operand.hbm [shape: f32[1,128], index: 5, kind: input, shape index: {}]   ;;  %s4715_s6 = inlined_call_operand.hbm [shape: bf16[128,128], index: 6, kind: input, shape index: {}]   ;;  %s4716_s7 = inlined_call_operand.hbm [shape: bf16[128,128], index: 7, kind: input, shape index: {}]   ;;  %s4717_s8 = inlined_call_operand.vmem [shape: f32[1,128], index: 8, kind: input, shape index: {}]   ;;  %s4718_s9 = inlined_call_operand.hbm [shape: bf16[128,384], index: 9, kind: input, shape index: {}]   ;;  %s4719_s10 = inlined_call_operand.vmem [shape: f32[1,384], index: 10, kind: input, shape index: {}]   ;;  %s4720_s11 = inlined_call_operand.hbm [shape: bf16[128,384], index: 11, kind: input, shape index: {}]   ;;  %s4721_s12 = inlined_call_operand.vmem [shape: f32[1,384], index: 12, kind: input, shape index: {}]   ;;  %s4722_s13 = inlined_call_operand.hbm [shape: bf16[128,512], index: 13, kind: input, shape index: {}]   ;;  %s4723_s14 = inlined_call_operand.vmem [shape: f32[1,512], index: 14, kind: input, shape index: {}]   ;;  %s4724_s15 = inlined_call_operand.hbm [shape: f32[8,512], index: 15, kind: output, shape index: {0}]   ;;  %s4725_s16 = inlined_call_operand.hbm [shape: f32[2,8,128], index: 16, kind: output, shape index: {1}]   ;;  %s4726_s17 = inlined_call_operand.hbm [shape: f32[2,8,128], index: 17, kind: output, shape index: {2}]   ;;  %s4727_s18 = inlined_call_operand.hbm [shape: f32[2,8,128], index: 18, kind: output, shape index: {3}]  }
   0x1   :  { %4740 = sst [smem:[#allocation40_spill]] %s4709_s0 }
   0x2   :  { %4741 = sst [smem:[#allocation41_spill]] %s4710_s1 }
   0x3   :  { %4742 = sst [smem:[#allocation42_spill]] %s4711_s2 }
   0x4   :  { %4743 = sst [smem:[#allocation43_spill]] %s4712_s3 }
   0x5   :  { %4744 = sst [smem:[#allocation44_spill]] %s4713_s4 }
   0x6   :  { %4745 = sst [smem:[#allocation45_spill]] %s4714_s5 }
   0x7   :  { %4746 = sst [smem:[#allocation46_spill]] %s4715_s6 }
   0x8   :  { %4747 = sst [smem:[#allocation47_spill]] %s4716_s7 }
   0x9   :  { %4748 = sst [smem:[#allocation48_spill]] %s4717_s8 }
   0xa   :  { %4749 = sst [smem:[#allocation49_spill]] %s4718_s9 }
   0xb   :  { %4750 = sst [smem:[#allocation50_spill]] %s4723_s14 }
   0xc   :  { %4751 = sst [smem:[#allocation51_spill]] %s4724_s15 }
   0xd   :  { %4752 = sst [smem:[#allocation52_spill]] %s4725_s16 }
   0xe   :  { %4753 = sst [smem:[#allocation53_spill]] %s4726_s17 }
   0xf   :  { %4754 = sst [smem:[#allocation54_spill]] %s4727_s18 }
  0x10   :  { %24 = vsyncpa [#allocation6], 0 }
  0x11   :  { %25 = vsyncpa [#allocation9], 0 }
  0x12   :  { %26 = vsyncpa [#allocation12], 0 }
  0x13   :  { %27 = vsyncpa [#allocation15], 0 }
  0x14   :  { %28 = vsyncpa [#allocation18], 0 }
  0x15   :  { %29 = vsyncpa [#allocation21], 0 }
  0x16   :  { %30 = vsyncpa [#allocation7], 0 }
  0x17   :  { %32 = vsyncpa [#allocation7 + $0x1], 0 }
  0x18   :  { %33 = vsyncpa [#allocation25], 0 }
  0x19   :  { %35 = vsyncpa [#allocation25 + $0x1], 0 }
  0x1a   :  { %36 = vsyncpa [#allocation28], 0 }
  0x1b   :  { %38 = vsyncpa [#allocation28 + $0x1], 0  ;;  %s4166_s27 = smov 0   ;;  %s4168_s28 = smov 0  }
  0x1c   :  { %s4170_s29 = smov 0   ;;  %s4172_s30 = smov 0  }
  0x1d   :  { %s4174_s0 = smov 0   ;;  %s4176_s19 = smov 0  }
  0x1e LB: > { %4755 = sst [smem:[#allocation39_spill]] %s4035_s30  ;;  %s4197_s1 = sadd.s32 4294967295, %s4043_s19   ;;  %s4043_s19 = sphi %s4176_s19, %s44_s19   ;;  %s4039_s0 = sphi %s4174_s0, %s4803_s0   ;;  %s4035_s30 = sphi %s4172_s30, %s4802_s30   ;;  %s4031_s29 = sphi %s4170_s29, %s4801_s29   ;;  %s4027_s28 = sphi %s4168_s28, %s4800_s28   ;;  %s4023_s27 = sphi %s4166_s27, %s4799_s27  }
  0x1f   : > { %p2836_p0 = scmp.ge.s32.totalorder %s4043_s19, 1  ;;  %p4731_p1 = scmp.eq.s32.totalorder %s4197_s1, 0 }
  0x20   : > { %p496_p2 = scmp.lt.s32.totalorder %s4043_s19, 3  ;;  %s4045_s21 = smov [#allocation5]  }
  0x21   : > { %s509_s22 = sshll.u32 %s4045_s21, 4  ;;  %s4046_s2 = smov [#allocation8]   ;;  %s510_s22 = int_to_ptr.vmem [resolvable:$true] %s509_s22 }
  0x22   : > { %p4202_p3 = pnand %p2836_p0, %p496_p2  ;;  %s520_s23 = sshll.u32 %s4046_s2, 4  ;;  %s521_s23 = int_to_ptr.vmem [resolvable:$true] %s520_s23 }
  0x23   : > { %s4047_s25 = smov [#allocation11]   ;;  %s3576_s21 = scalar_lea.vmem %s510_s22, 64 }
  0x24   : > { %s4756_s20 = scalar_select %p4202_p3, 1, 0 }
  0x25   : > { %p3281_p5 = pneg %p4202_p3  ;;  %s543_s26 = sshll.u32 %s4047_s25, 4  ;;  %s544_s26 = int_to_ptr.vmem [resolvable:$true] %s543_s26 }
  0x26   : > { %p3577_p8 = scmp.ne.s32.totalorder %s510_s22, %s3576_s21  ;;  %p3584_p11 = scmp.lt.s32.totalorder %s510_s22, %s510_s22 }
  0x27   : > { %p4211_p6 = pnand %p3281_p5, %p4731_p1  ;;  %p3585_p12 = scmp.lt.s32.totalorder %s3576_s21, %s3576_s21 }
  0x29   : > { %p4217_p7 = pneg %p4211_p6  ;;  %p3586_p13 = por %p3585_p12, %p3584_p11 }
  0x2b   : > { %p3579_p9 = pnand %p3577_p8, %p4217_p7 }
  0x2d   : > { %p3580_p10 = pneg %p3579_p9 }
  0x2f   : > { %p3587_p0 = pnand %p3586_p13, %p3580_p10 }
  0x31   : > { %3590 = shalt.err (!%p3587_p0)
}
  0x32   : > { %s4759_s16 = sld [smem:[#allocation40_spill]]  ;;  %s3602_s18 = scalar_lea.vmem %s521_s23, 128 }
  0x33   : > { %p3603_p2 = scmp.ne.s32.totalorder %s521_s23, %s3602_s18  ;;  %p3610_p1 = scmp.lt.s32.totalorder %s521_s23, %s521_s23 }
  0x34   : > { %p3611_p8 = scmp.lt.s32.totalorder %s3602_s18, %s3602_s18 }
  0x35   : > { %p3605_p5 = pnand %p3603_p2, %p4217_p7 }
  0x36   : > { %p3612_p9 = por %p3611_p8, %p3610_p1 }
  0x37   : > { %p3606_p4 = pneg %p3605_p5 }
  0x38   : > { %3284 = dma.hbm_to_vmem [thread:$0]  (!%p4211_p6), %s4759_s16, 64, %s510_s22, [#allocation6]  }
  0x39   : > { %p3613_p3 = pnand %p3612_p9, %p3606_p4 }
  0x3b   : > { %3616 = shalt.err (!%p3613_p3)
}
  0x3c   : > { %s4760_s14 = sld [smem:[#allocation41_spill]]  ;;  %s3628_s2 = scalar_lea.vmem %s544_s26, 1024 }
  0x3d   : > { %p3629_p10 = scmp.ne.s32.totalorder %s544_s26, %s3628_s2  ;;  %p3636_p13 = scmp.lt.s32.totalorder %s544_s26, %s544_s26 }
  0x3e   : > { %p3637_p0 = scmp.lt.s32.totalorder %s3628_s2, %s3628_s2 }
  0x3f   : > { %p3631_p11 = pnand %p3629_p10, %p4217_p7 }
  0x40   : > { %p3638_p2 = por %p3637_p0, %p3636_p13 }
  0x41   : > { %p3632_p12 = pneg %p3631_p11 }
  0x42   : > { %3287 = dma.hbm_to_vmem [thread:$0]  (!%p4211_p6), %s4760_s14, 128, %s521_s23, [#allocation9]  }
  0x43   : > { %p3639_p5 = pnand %p3638_p2, %p3632_p12 }
  0x45   : > { %3642 = shalt.err (!%p3639_p5)
}
  0x46   : > { %s4048_s16 = smov 64   ;;  %s4049_s18 = smov 4  }
  0x47   : > { %s4761_s3 = sld [smem:[#allocation43_spill]]  ;;  %s4050_s22 = smov [#allocation14]  }
  0x48   : > { %s570_s23 = sshll.u32 %s4050_s22, 4  ;;  %s4051_s25 = smov [#allocation17]   ;;  %s571_s23 = int_to_ptr.vmem [resolvable:$true] %s570_s23 }
  0x49   : > { %s593_s21 = sshll.u32 %s4051_s25, 4  ;;  %s3654_s2 = scalar_lea.vmem %s571_s23, 16  ;;  %s594_s21 = int_to_ptr.vmem [resolvable:$true] %s593_s21 }
  0x4a   : > { %p3655_p1 = scmp.ne.s32.totalorder %s571_s23, %s3654_s2  ;;  %s3661_s30 = scalar_lea.vmem %s571_s23, 32 }
  0x4b   : > { %p3662_p8 = scmp.lt.s32.totalorder %s571_s23, %s571_s23  ;;  %p3663_p9 = scmp.lt.s32.totalorder %s3661_s30, %s3654_s2 }
  0x4c   : > { %p3657_p3 = pnand %p3655_p1, %p4217_p7 }
  0x4d   : > { %3293 = dma.hbm_to_vmem [thread:$0]  (!%p4211_p6), %s4761_s3, 1024, %s544_s26, [#allocation12], %s4048_s16, %s4048_s16, %s4049_s18  }
  0x4e   : > { %p3658_p4 = pneg %p3657_p3  ;;  %p3664_p10 = por %p3663_p9, %p3662_p8 }
  0x50   : > { %p3665_p11 = pnand %p3664_p10, %p3658_p4 }
  0x52   : > { %3668 = shalt.err (!%p3665_p11)
}
  0x53   : > { %s4762_s5 = sld [smem:[#allocation45_spill]]  ;;  %s3680_s15 = scalar_lea.vmem %s594_s21, 1024 }
  0x54   : > { %p3681_p12 = scmp.ne.s32.totalorder %s594_s21, %s3680_s15  ;;  %p3688_p2 = scmp.lt.s32.totalorder %s594_s21, %s594_s21 }
  0x55   : > { %p3689_p5 = scmp.lt.s32.totalorder %s3680_s15, %s3680_s15 }
  0x56   : > { %p3683_p13 = pnand %p3681_p12, %p4217_p7 }
  0x57   : > { %p3690_p1 = por %p3689_p5, %p3688_p2 }
  0x58   : > { %p3684_p0 = pneg %p3683_p13 }
  0x59   : > { %3299 = dma.hbm_to_vmem [thread:$0]  (!%p4211_p6), %s4762_s5, 16, %s571_s23, [#allocation15]  }
  0x5a   : > { %p3691_p3 = pnand %p3690_p1, %p3684_p0 }
  0x5c   : > { %3694 = shalt.err (!%p3691_p3)
}
  0x5d   : > { %s4763_s7 = sld [smem:[#allocation47_spill]]  ;;  %s4052_s23 = smov [#allocation10]  }
  0x5e   : > { %s530_s25 = sshll.u32 %s4052_s23, 4  ;;  %s4053_s2 = smov [#allocation13]   ;;  %s531_s25 = int_to_ptr.vmem [resolvable:$true] %s530_s25 }
  0x5f   : > { %s556_s14 = sshll.u32 %s4053_s2, 4  ;;  %s3706_s26 = scalar_lea.vmem %s531_s25, 512  ;;  %s557_s14 = int_to_ptr.vmem [resolvable:$true] %s556_s14 }
  0x60   : > { %p3707_p4 = scmp.ne.s32.totalorder %s531_s25, %s3706_s26  ;;  %p3714_p10 = scmp.lt.s32.totalorder %s531_s25, %s531_s25 }
  0x61   : > { %p3715_p11 = scmp.lt.s32.totalorder %s3706_s26, %s3706_s26 }
  0x62   : > { %p3709_p8 = pnand %p3707_p4, %p4217_p7 }
  0x63   : > { %3305 = dma.hbm_to_vmem [thread:$0]  (!%p4211_p6), %s4763_s7, 1024, %s594_s21, [#allocation18], %s4048_s16, %s4048_s16, %s4049_s18  }
  0x64   : > { %p3710_p9 = pneg %p3709_p8  ;;  %p3716_p12 = por %p3715_p11, %p3714_p10 }
  0x66   : > { %p3717_p13 = pnand %p3716_p12, %p3710_p9 }
  0x68   : > { %3720 = shalt.err (!%p3717_p13)
}
  0x69   : > { %s4764_s30 = sld [smem:[#allocation42_spill]]  ;;  %s3732_s22 = scalar_lea.vmem %s557_s14, 1024 }
  0x6a   : > { %p3733_p0 = scmp.ne.s32.totalorder %s557_s14, %s3732_s22  ;;  %p3740_p1 = scmp.lt.s32.totalorder %s557_s14, %s557_s14 }
  0x6b   : > { %p3741_p3 = scmp.lt.s32.totalorder %s3732_s22, %s3732_s22 }
  0x6c   : > { %p3735_p2 = pnand %p3733_p0, %p4217_p7 }
  0x6d   : > { %p3742_p4 = por %p3741_p3, %p3740_p1 }
  0x6e   : > { %p3736_p5 = pneg %p3735_p2 }
  0x6f   : > { %3290 = dma.hbm_to_vmem [thread:$0]  (!%p4211_p6), %s4764_s30, 512, %s531_s25, [#allocation9], %s4048_s16, %s4048_s16, %s4049_s18  }
  0x70   : > { %p3743_p8 = pnand %p3742_p4, %p3736_p5 }
  0x72   : > { %3746 = shalt.err (!%p3743_p8)
}
  0x73   : > { %s4765_s4 = sld [smem:[#allocation44_spill]]  ;;  %s4054_s25 = smov [#allocation16]  }
  0x74   : > { %s580_s26 = sshll.u32 %s4054_s25, 4  ;;  %s4055_s21 = smov [#allocation19]   ;;  %s581_s26 = int_to_ptr.vmem [resolvable:$true] %s580_s26 }
  0x75   : > { %s609_s15 = sshll.u32 %s4055_s21, 4  ;;  %s3758_s30 = scalar_lea.vmem %s581_s26, 1024  ;;  %s610_s15 = int_to_ptr.vmem [resolvable:$true] %s609_s15 }
  0x76   : > { %p3759_p9 = scmp.ne.s32.totalorder %s581_s26, %s3758_s30  ;;  %p3766_p12 = scmp.lt.s32.totalorder %s581_s26, %s581_s26 }
  0x77   : > { %p3767_p13 = scmp.lt.s32.totalorder %s3758_s30, %s3758_s30 }
  0x78   : > { %p3761_p10 = pnand %p3759_p9, %p4217_p7 }
  0x79   : > { %3296 = dma.hbm_to_vmem [thread:$0]  (!%p4211_p6), %s4765_s4, 1024, %s557_s14, [#allocation12], %s4048_s16, %s4048_s16, %s4049_s18  }
  0x7a   : > { %p3762_p11 = pneg %p3761_p10  ;;  %p3768_p0 = por %p3767_p13, %p3766_p12 }
  0x7c   : > { %p3769_p2 = pnand %p3768_p0, %p3762_p11 }
  0x7e   : > { %3772 = shalt.err (!%p3769_p2)
}
  0x7f   : > { %s4766_s6 = sld [smem:[#allocation46_spill]]  ;;  %s3784_s23 = scalar_lea.vmem %s610_s15, 3072 }
  0x80   : > { %p3785_p5 = scmp.ne.s32.totalorder %s610_s15, %s3784_s23  ;;  %p3792_p4 = scmp.lt.s32.totalorder %s610_s15, %s610_s15 }
  0x81   : > { %p3793_p8 = scmp.lt.s32.totalorder %s3784_s23, %s3784_s23 }
  0x82   : > { %p3787_p1 = pnand %p3785_p5, %p4217_p7 }
  0x83   : > { %p3794_p9 = por %p3793_p8, %p3792_p4 }
  0x84   : > { %p3788_p3 = pneg %p3787_p1 }
  0x85   : > { %3302 = dma.hbm_to_vmem [thread:$0]  (!%p4211_p6), %s4766_s6, 1024, %s581_s26, [#allocation15], %s4048_s16, %s4048_s16, %s4049_s18  }
  0x86   : > { %p3795_p10 = pnand %p3794_p9, %p3788_p3 }
  0x88   : > { %3798 = shalt.err (!%p3795_p10)
}
  0x89   : > { %s4056_s2 = smov 192   ;;  %s4057_s25 = smov 12  }
  0x8a   : > { %s4767_s9 = sld [smem:[#allocation49_spill]]  ;;  %s4058_s16 = smov [#allocation20]  }
  0x8b   : > { %s625_s18 = sshll.u32 %s4058_s16, 4  ;;  %s626_s18 = int_to_ptr.vmem [resolvable:$true] %s625_s18 }
  0x8c   : > { %s3810_s26 = scalar_lea.vmem %s626_s18, 3072  ;;  %p3818_p0 = scmp.lt.s32.totalorder %s626_s18, %s626_s18 }
  0x8d   : > { %p3811_p11 = scmp.ne.s32.totalorder %s626_s18, %s3810_s26  ;;  %p3819_p2 = scmp.lt.s32.totalorder %s3810_s26, %s3810_s26 }
  0x8f   : > { %p3813_p12 = pnand %p3811_p11, %p4217_p7  ;;  %p3820_p5 = por %p3819_p2, %p3818_p0 }
  0x90   : > { %3308 = dma.hbm_to_vmem [thread:$0]  (!%p4211_p6), %s4767_s9, 3072, %s610_s15, [#allocation18], %s4056_s2, %s4056_s2, %s4057_s25  }
  0x91   : > { %p3814_p13 = pneg %p3813_p12 }
  0x93   : > { %p3821_p1 = pnand %p3820_p5, %p3814_p13 }
  0x95   : > { %3824 = shalt.err (!%p3821_p1)
}
  0x96   : > { %3311 = dma.hbm_to_vmem [thread:$0]  (!%p4211_p6), %s4720_s11, 3072, %s626_s18, [#allocation21], %s4056_s2, %s4056_s2, %s4057_s25  }
  0x97   : > { %s4735_s17 = sadd.s32 4294967294, %s4043_s19   ;;  %s56_s15 = sadd.s32 1, %s4039_s0 }
  0x98   : > { %p58_p7 = scmp.ge.s32.totalorder %s56_s15, 2  ;;  %s338_s24 = sadd.s32 1, %s4031_s29 }
  0x99   : > { %p345_p3 = scmp.ne.s32.totalorder %s4031_s29, %s4027_s28  ;;  %p346_p4 = scmp.eq.s32.totalorder %s4043_s19, 0 }
  0x9a   : > { %s4805_s15 = smov (%p58_p7, %s56_s15), 0  ;;  %p351_p9 = scmp.ne.s32.totalorder %s4027_s28, %s4023_s27 }
  0x9b   : > { %p4314_p8 = por %p346_p4, %p345_p3  ;;  %s335_s2 = ssub.s32 %s4039_s0, %s4805_s15 }
  0x9c   : > { %p405_p6 = scmp.eq.s32.totalorder %s4197_s1, 1  ;;  %p336_p10 = scmp.eq.s32.totalorder %s335_s2, 0 }
  0x9d   : > { %p4769_p11 = scmp.eq.s32.totalorder %s4197_s1, 0  ;;  %p411_p0 = scmp.eq.s32.totalorder %s4735_s17, 1 }
  0x9e   : > { %p4329_p13 = por %p405_p6, %p345_p3  ;;  %p3339_p5 = scmp.lt.s32.totalorder %s4043_s19, 2 }
  0x9f   : > { %p4325_p12 = por %p4769_p11, %p351_p9  ;;  %p4338_p2 = por %p411_p0, %p351_p9 }
  0xa0   : > { %s4336_s30 = scalar_select %p336_p10, %s4031_s29, %s338_s24  }
  0xa1   : > { %s642_s18 = sand.u32 1, %s4043_s19   ;;  %s644_s26 = sand.u32 1, %s4031_s29  }
  0xa2   : > { %s2848_s14 = sshll.u32 %s644_s26, 7  ;;  %s2991_s22 = sshll.u32 %s4039_s0, 7 }
  0xa3   : > { %s653_s4 = scalar_lea.hbm %s4722_s13, %s2991_s22  ;;  %s646_s5 = scalar_lea.vmem [#allocation22], %s2848_s14 }
  0xa4   : > { %s654_s6 = sshll.u32 %s646_s5, 4  ;;  %p4351_p1 = pnand %p3339_p5, %p4314_p8  ;;  %s655_s6 = int_to_ptr.vmem [resolvable:$true] %s654_s6 }
  0xa5   : > { %s643_s17 = scalar_lea.sflag [#allocation6], %s642_s18  ;;  %s3838_s7 = scalar_lea.vmem %s655_s6, 2048 }
  0xa6   : > { %p3827_p7 = pneg %p4351_p1  ;;  %p3839_p3 = scmp.ne.s32.totalorder %s655_s6, %s3838_s7 }
  0xa7   : > { %s4059_s26 = smov [#allocation22]  }
  0xa8   : > { %p3841_p4 = pnand %p3839_p3, %p3827_p7  ;;  %s3843_s9 = sshll.u32 %s4059_s26, 4  ;;  %s3844_s9 = int_to_ptr.vmem [resolvable:$false] %s3843_s9 }
  0xa9   : > { %s3845_s3 = scalar_lea.vmem %s3844_s9, 4096  ;;  %p3846_p6 = scmp.lt.s32.totalorder %s655_s6, %s3844_s9 }
  0xaa   : > { %p3842_p9 = pneg %p3841_p4  ;;  %p3847_p10 = scmp.lt.s32.totalorder %s3845_s3, %s3838_s7 }
  0xac   : > { %p3848_p11 = por %p3847_p10, %p3846_p6 }
  0xae   : > { %p3849_p0 = pnand %p3848_p11, %p3842_p9 }
  0xb0   : > { %3852 = shalt.err (!%p3849_p0)
}
  0xb1   : > { %s4060_s5 = smov 256   ;;  %s4061_s23 = smov 128  }
  0xb2   : > { %s4062_s14 = smov 8   ;;  %p4774_p8 = scmp.ne.s32.totalorder %s4756_s20, 0 }
  0xb3   : > { %3315 = dma.hbm_to_vmem [thread:$0]  (!%p4351_p1), %s653_s4, 2048, %s655_s6, %s643_s17, %s4060_s5, %s4061_s23, %s4062_s14  }
  0xb4   : > { %676 = sbr.rel (%p4774_p8) target bundleno = 2167 (0x877), region = 80  ;;  %p4775_p5 = scmp.eq.s32.totalorder (!%p4774_p8), %s4197_s1, 0 }
  0xb9   : > { %3982 = dma.done.wait (%p4775_p5), [#allocation6], 64   ;;  %p4776_p7 = pmov %p4775_p5 }
  0xba   : > { %p4777_p3 = pmov %p4775_p5 }
  0xbb   : > { %3984 = vsyncadd (%p4776_p7), [#allocation6], 4294967232 }
  0xbc   : > { %3986 = dma.done.wait (%p4777_p3), [#allocation9], 640   ;;  %p4778_p4 = pmov %p4777_p3 }
  0xbd   : > { %p4779_p9 = pmov %p4777_p3 }
  0xbe   : > { %3988 = vsyncadd (%p4778_p4), [#allocation9], 4294966656 }
  0xbf   : > { %3990 = dma.done.wait (%p4779_p9), [#allocation12], 2048   ;;  %p4780_p1 = pmov %p4777_p3 }
  0xc1   : > { %3992 = vsyncadd (%p4780_p1), [#allocation12], 4294965248  ;;  %p4781_p6 = pmov %p4780_p1 }
  0xc2   : > { %p4782_p10 = pmov %p4780_p1 }
  0xc3   : > { %3994 = dma.done.wait (%p4781_p6), [#allocation15], 1040  }
  0xc4   : > { %3996 = vsyncadd (%p4782_p10), [#allocation15], 4294966256  ;;  %p4783_p11 = pmov %p4780_p1 }
  0xc5   : > { %p4784_p0 = pmov %p4780_p1 }
  0xc6   : > { %3998 = dma.done.wait (%p4783_p11), [#allocation18], 4096  }
  0xc7   : > { %4000 = vsyncadd (%p4784_p0), [#allocation18], 4294963200  ;;  %p4785_p8 = pmov %p4784_p0 }
  0xc8   : > { %p4786_p5 = pmov %p4784_p0 }
  0xc9   : > { %4002 = dma.done.wait (%p4785_p8), [#allocation21], 3072  }
  0xca   : > { %4004 = vsyncadd (%p4786_p5), [#allocation21], 4294964224  ;;  %s4736_s4 = sand.u32 1, %s4197_s1   ;;  %s4387_s6 = sand.u32 1, %s4027_s28  }
  0xcb   : > { %s2862_s7 = sshll.u32 %s4387_s6, 7  ;;  %s719_s9 = scalar_lea.sflag [#allocation6], %s4736_s4 }
  0xcc   : > { %s4392_s20 = scalar_lea.vmem [#allocation22], %s2862_s7 }
  0xcd   : > { %4006 = dma.done.wait (%p4325_p12), %s719_s9, 2048  }
  0xce   : > { %4008 = vsyncadd (%p4325_p12), %s719_s9, 4294965248  ;;  %v4063_v0 = vmov 0.0   ;;  %vm4064_vm0 = vmmov 0   ;;  %v3422_v1 = vld [vmem:[#allocation13 + $0x38] sm:$0xff]   ;;  %v3424_v3 = vld [vmem:[#allocation13 + $0x30] sm:$0xff]   ;;  %vm1091_vm1 = vcmask 1043456   ;;  %v1045_v42 = vlaneseq }
  0xcf   : > { %3063 = vmatprep.subr.bf16.mxu0 %v4063_v0  ;;  %3083 = vmatprep.subr.bf16.mxu1 %v4063_v0  ;;  %v3423_v2 = vld [vmem:[#allocation11 + $0x38] sm:$0xff]   ;;  %v3425_v4 = vld [vmem:[#allocation11 + $0x30] sm:$0xff]   ;;  %v3426_v5 = vld [vmem:[#allocation13 + $0x28] sm:$0xff]   ;;  %v4065_v40 = vmov 1966171168   ;;  %s4437_s17 = sshll.u32 %s4387_s6, 3 }
  0xd0   : > { %3079 = vmatprep.mubr.msk.bf16.mxu0 %vm4064_vm0, %v4063_v0  ;;  %3099 = vmatprep.mubr.msk.bf16.mxu1 %vm4064_vm0, %v4063_v0  ;;  %v3427_v6 = vld [vmem:[#allocation11 + $0x28] sm:$0xff]   ;;  %v3428_v7 = vld [vmem:[#allocation13 + $0x20] sm:$0xff]   ;;  %v3430_v9 = vld [vmem:[#allocation13 + $0x18] sm:$0xff]   ;;  %v1043_v41 = vunpack.c.l.s4 %v4065_v40  ;;  %v4434_v44 = vshrl.u32 %v1045_v42, 7  ;;  %s4738_s25 = scalar_lea.vmem [#allocation27], %s4437_s17  ;;  %vm1087_vm2 = vcmask 64512  }
  0xd1   : > { %3064 = vmatpush3.bf16.msra.mxu0 %v3422_v1  ;;  %3084 = vmatpush3.bf16.msra.mxu1 %v3423_v2  ;;  %v3429_v8 = vld [vmem:[#allocation11 + $0x20] sm:$0xff]   ;;  %v3431_v10 = vld [vmem:[#allocation11 + $0x18] sm:$0xff]   ;;  %v3432_v11 = vld [vmem:[#allocation13 + $0x10] sm:$0xff]   ;;  %vm1549_vm3 = vcmask 1041409   ;;  %vm1552_vm4 = vcmask 1042434   ;;  %vm1555_vm5 = vcmask 1043459  }
  0xd2   : > { %3065 = vmatprep.subr.bf16.mxu0 %v4063_v0  ;;  %3085 = vmatprep.subr.bf16.mxu1 %v4063_v0  ;;  %v3433_v12 = vld [vmem:[#allocation11 + $0x10] sm:$0xff]   ;;  %v3434_v13 = vld [vmem:[#allocation13 + $0x8] sm:$0xff]   ;;  %v3436_v15 = vld [vmem:[#allocation13] sm:$0xff]   ;;  %v1044_v43 = vunpack.c.0.s8 %v1043_v41  ;;  %v4444_v50 = vsub.s32 0, %v4434_v44  ;;  %vm1558_vm6 = vcmask 1044484   ;;  %vm1561_vm7 = vcmask 1045509  }
  0xd3   : > { %v3435_v14 = vld [vmem:[#allocation11 + $0x8] sm:$0xff]   ;;  %v812_v16 = vld [vmem:[#allocation8] sm:$0xff]  ;;  %v3437_v17 = vld [vmem:[#allocation11] sm:$0xff]   ;;  %vm1564_vm8 = vcmask 1046534   ;;  %vm1567_vm9 = vcmask 1047559   ;;  %s4787_s8 = sld [smem:[#allocation48_spill]] }
  0xd4   : > { %v4418_v18 = vpack.c.bf16 %v812_v16, %v812_v16  ;;  %v4420_v19 = vld [vmem:[#allocation5] sm:$0xf]  ;;  %v2884_v22 = vld [vmem:[#allocation14] ss:$0 sm:$0xff]  ;;  %v1078_v36 = vld [vmem:[#allocation10 + $0x10] sm:$0xf]  ;;  %v1047_v46 = vsub.s32 %v1044_v43, %v4434_v44 }
  0xd5   : > { %3066 = vmatpush3.bf16.msra.mxu0 %v3424_v3  ;;  %3086 = vmatpush3.bf16.msra.mxu1 %v3425_v4  ;;  %v1074_v35 = vld [vmem:[#allocation10] sm:$0xf]  ;;  %v1297_v38 = vsel %vm1091_vm1, %v1078_v36, 0  ;;  %v1075_v53 = vld [vmem:[#allocation10 + $0x4] sm:$0xf]  ;;  %v3447_v36 = vld [vmem:[#allocation16 + $0x10] sm:$0xff]  }
  0xd6   : > { %3067 = vmatprep.subr.bf16.mxu0 %v4063_v0  ;;  %3087 = vmatprep.subr.bf16.mxu1 %v4063_v0  ;;  %v1093_v37 = vsel %vm1091_vm1, %v1074_v35, 0  ;;  %v1080_v57 = vld [vmem:[#allocation10 + $0x18] sm:$0xf]  ;;  %v1144_v59 = vsel %vm1091_vm1, %v1075_v53, 0  ;;  %v1076_v3 = vld [vmem:[#allocation10 + $0x8] sm:$0xf] }
  0xd7   : > { %v1399_v63 = vsel %vm1091_vm1, %v1080_v57, 0  ;;  %v3446_v35 = vld [vmem:[#allocation17 + $0x20] sm:$0xff]   ;;  %v3452_v41 = vld [vmem:[#allocation17 + $0x8] sm:$0xff]   ;;  %s4788_s5 = sld [smem:[#allocation39_spill]]  ;;  %s4737_s23 = scalar_lea.vmem [#allocation26], %s4437_s17 }
  0xd8   : > { %v3451_v40 = vld [vmem:[#allocation16] sm:$0xff]   ;;  %v3456_v43 = vld [vmem:[#allocation19 + $0xac] ss:$12 sps:$4 sm:$0xff]   ;;  %s2863_s22 = sshll.u32 %s4387_s6, 4  ;;  %s4790_s9 = sld [smem:[#allocation51_spill]] }
  0xd9   : > { %3068 = vmatpush3.bf16.msra.mxu0 %v3426_v5  ;;  %3088 = vmatpush3.bf16.msra.mxu1 %v3427_v6  ;;  %v1195_v6 = vsel %vm1091_vm1, %v1076_v3, 0  ;;  %v3453_v42 = vld [vmem:[#allocation17] sm:$0xff]   ;;  %s773_s2 = scalar_lea.vmem [#allocation23], %s2863_s22  ;;  %s4067_s4 = smov [#allocation23]  }
  0xda   : > { %3069 = vmatprep.subr.bf16.mxu0 %v4063_v0  ;;  %3089 = vmatprep.subr.bf16.mxu1 %v4063_v0  ;;  %s2518_s3 = sshll.u32 %s773_s2, 4  ;;  %s2519_s3 = int_to_ptr.vmem [resolvable:$true] %s2518_s3 }
  0xdb   : > { %s3853_s22 = scalar_lea.vmem %s2519_s3, 256 }
  0xdc   : > { %p3854_p7 = scmp.ne.s32.totalorder %s2519_s3, %s3853_s22 }
  0xdd   : > { %3070 = vmatpush3.bf16.msra.mxu0 %v3428_v7  ;;  %3090 = vmatpush3.bf16.msra.mxu1 %v3429_v8  ;;  %s2867_s14 = sshll.u32 %s4788_s5, 1  ;;  %s4579_s24 = sshll.u32 %s4788_s5, 7 }
  0xde   : > { %3071 = vmatprep.subr.bf16.mxu0 %v4063_v0  ;;  %3091 = vmatprep.subr.bf16.mxu1 %v4063_v0  ;;  %p799_p12 = scmp.lt.s32.totalorder %s2867_s14, 3  ;;  %s2992_s26 = sshll.u32 %s4788_s5, 8 }
  0xdf   : > { %p3855_p3 = pnand %p3854_p7, %p4329_p13 }
  0xe0   : > { %s4807_s14 = smov (!%p799_p12, %s2867_s14), 3 }
  0xe1   : > { %3072 = vmatpush3.bf16.msra.mxu0 %v3430_v9  ;;  %3092 = vmatpush3.bf16.msra.mxu1 %v3431_v10  ;;  %v1077_v9 = vld [vmem:[#allocation10 + $0xc] sm:$0xf]  ;;  %p3856_p4 = pneg %p3855_p3 }
  0xe2   : > { %3073 = vmatprep.subr.bf16.mxu0 %v4063_v0  ;;  %3093 = vmatprep.subr.bf16.mxu1 %v4063_v0 }
  0xe5   : > { %3074 = vmatpush3.bf16.msra.mxu0 %v3432_v11  ;;  %3094 = vmatpush3.bf16.msra.mxu1 %v3433_v12  ;;  %v1246_v11 = vsel %vm1091_vm1, %v1077_v9, 0 }
  0xe6   : > { %3075 = vmatprep.subr.bf16.mxu0 %v4063_v0  ;;  %3095 = vmatprep.subr.bf16.mxu1 %v4063_v0 }
  0xe9   : > { %3076 = vmatpush3.bf16.msra.mxu0 %v3434_v13  ;;  %3096 = vmatpush3.bf16.msra.mxu1 %v3435_v14  ;;  %v1079_v14 = vld [vmem:[#allocation10 + $0x14] sm:$0xf] }
  0xea   : > { %3077 = vmatprep.subr.bf16.mxu0 %v4063_v0  ;;  %3097 = vmatprep.subr.bf16.mxu1 %v4063_v0  ;;  %v1348_v16 = vsel %vm1091_vm1, %v1079_v14, 0 }
  0xed   : > { %3078 = vmatpush3.bf16.msra.mxu0 %v3436_v15  ;;  %3098 = vmatpush3.bf16.msra.mxu1 %v3437_v17 }
  0xee   : > { %3127 = vmatprep.subr.bf16.mxu0 %v4063_v0  ;;  %3103 = vmatprep.subr.bf16.mxu1 %v4063_v0 }
  0xf0   : > { %3080 = vmatmul.mubr.bf16.vlgmr.msra.gmra.mxu0 %v4418_v18  ;;  %3100 = vmatmul.mubr.bf16.vlgmr.msra.gmra.mxu1 %v4420_v19 }
  0xf1   : > { %3129 = vmatprep.mubr.msk.bf16.mxu0 %vm4064_vm0, %v4063_v0  ;;  %3105 = vmatprep.mubr.msk.bf16.mxu1 %vm4064_vm0, %v4063_v0 }
  0xf2   : > { %3104 = vmatpush3.bf16.msra.mxu1 %v1093_v37  ;;  %3128 = vmatpush3.bf16.msra.mxu0 %v1297_v38  ;;  %v3448_v37 = vld [vmem:[#allocation17 + $0x18] sm:$0xff]   ;;  %v3449_v38 = vld [vmem:[#allocation16 + $0x8] sm:$0xff]  }
  0xf3   : > { %3109 = vmatprep.subr.bf16.mxu1 %v4063_v0  ;;  %3139 = vmatprep.subr.bf16.mxu0 %v4063_v0 }
 0x1b0   : > { %v928_v20 = vpop.f32.mrf.mxu0  ;;  %v1016_v21 = vpop.f32.mrf.mxu1 }
 0x1b1   : > { %v1017_v23 = vadd.f32 %v1016_v21, %v928_v20  ;;  %v1081_v21 = vld [vmem:[#allocation10 + $0x1c] sm:$0xf] }
 0x1b2   : > { %v3081_v24 = vpop.f32.mrf.mxu0  ;;  %v3101_v25 = vpop.f32.mrf.mxu1 }
 0x1b3   : > { %v1029_v27 = vadd.f32 %v2884_v22, %v1017_v23  ;;  %v1450_v23 = vsel %vm1091_vm1, %v1081_v21, 0 }
 0x1b4   : > { %v931_v26 = vpop.f32.mrf.mxu0  ;;  %v1019_v28 = vpop.f32.mrf.mxu1 }
 0x1b5   : > { %1030 = vmax.xlane.f32.xlu0 %v1029_v27  ;;  %v3439_v28 = vld [vmem:[#allocation16 + $0x30] sm:$0xff]  }
 0x1b6   : > { %v3082_v29 = vpop.f32.mrf.mxu0  ;;  %v3102_v30 = vpop.f32.mrf.mxu1 }
 0x1b7   : > { %v3440_v29 = vld [vmem:[#allocation17 + $0x38] sm:$0xff]   ;;  %v3441_v30 = vld [vmem:[#allocation16 + $0x28] sm:$0xff]  }
 0x23e   : > { %v1031_v31 = vpop.xlane.xlu0 %1030 }
 0x23f   : > { %v1032_v32 = vsub.f32 %v1029_v27, %v1031_v31  ;;  %v3438_v27 = vld [vmem:[#allocation16 + $0x38] sm:$0xff]   ;;  %v3442_v31 = vld [vmem:[#allocation17 + $0x30] sm:$0xff]  }
 0x241   : > { %v1033_v33 = vmul.f32 1.442695, %v1032_v32  ;;  %v3443_v32 = vld [vmem:[#allocation16 + $0x20] sm:$0xff]  }
 0x243   : > { %3542 = vpow2.f32 %v1033_v33  ;;  %v3444_v33 = vld [vmem:[#allocation17 + $0x28] sm:$0xff]  }
 0x250   : > { %v3543_v34 = vpop.eup %3542 }
 0x251   : > { %1035 = vadd.xlane.f32.xlu0 %v3543_v34 }
 0x2da   : > { %v1036_v39 = vpop.xlane.xlu0 %1035 }
 0x2db   : > { %3544 = vrcp.f32 %v1036_v39  ;;  %v3450_v39 = vld [vmem:[#allocation17 + $0x10] sm:$0xff]  }
 0x2e8   : > { %v3545_v45 = vpop.eup %3544 }
 0x2e9   : > { %v1038_v47 = vmul.f32 %v3545_v45, %v3543_v34  ;;  %v3445_v34 = vld [vmem:[#allocation16 + $0x18] sm:$0xff]  }
 0x2ea   : > { %v3457_v45 = vld [vmem:[#allocation19 + $0xb0] ss:$12 sps:$4 sm:$0xff]  }
 0x2eb   : > { %v1040_v48 = vpack.c.bf16 %v1038_v47, %v1038_v47  ;;  %1039 = vst [vmem:[%s4738_s25] sm:$0xff] %v1038_v47  ;;  %v3465_v47 = vld [vmem:[#allocation19 + $0x80] ss:$12 sps:$4 sm:$0xff]  }
 0x2ed   : > { %v1048_v49 = vrot.slane %v1040_v48, %v1047_v46  ;;  %v3473_v48 = vld [vmem:[#allocation19 + $0x50] ss:$12 sps:$4 sm:$0xff]  }
 0x2ef   : > { %v1049_v51 = vcombine.high %v1048_v49, %v1048_v49  ;;  %v1056_v52 = vrot.slane %v1048_v49, %v1047_v46  ;;  %v3477_v49 = vld [vmem:[#allocation19 + $0x38] ss:$12 sps:$4 sm:$0xff]  }
 0x2f1   : > { %v2885_v54 = vpack.i.b16 %v1056_v52, %v1056_v52  ;;  %v1064_v55 = vcombine.high %v1056_v52, %v1056_v52  ;;  %v1063_v56 = vrot.slane %v1049_v51, %v1047_v46  ;;  %v1067_v61 = vunpack.i.h.s16 %v1056_v52  ;;  %v3461_v46 = vld [vmem:[#allocation19 + $0x98] ss:$12 sps:$4 sm:$0xff]  }
 0x2f3   : > { %v1086_v58 = vrot.slane %v2885_v54, %v4444_v50  ;;  %v2891_v60 = vpack.i.b16 %v1064_v55, %v1064_v55  ;;  %v1065_v1 = vcombine.high %v1063_v56, %v1063_v56  ;;  %v1135_v2 = vpack.i.b16 %v1067_v61, %v1067_v61 }
 0x2f4   : > { %v2888_v8 = vpack.i.b16 %v1063_v56, %v1063_v56  ;;  %v1069_v12 = vunpack.i.h.s16 %v1063_v56  ;;  %v1071_v17 = vunpack.i.h.s16 %v1064_v55 }
 0x2f5   : > { %3106 = vmatmul.mubr.msk.bf16.vlgmr.msra.gmra.mxu1 %vm1087_vm2, %v1086_v58  ;;  %v1292_v62 = vrot.slane %v2891_v60, %v4444_v50  ;;  %v2894_v4 = vpack.i.b16 %v1065_v1, %v1065_v1  ;;  %v1139_v5 = vrot.slane %v1135_v2, %v4444_v50  ;;  %v1073_v24 = vunpack.i.h.s16 %v1065_v1 }
 0x2f6   : > { %3110 = vmatpush3.bf16.msra.mxu1 %v1144_v59  ;;  %3111 = vmatprep.mubr.msk.bf16.mxu1 %vm4064_vm0, %v4063_v0  ;;  %v1190_v10 = vrot.slane %v2888_v8, %v4444_v50  ;;  %v1237_v13 = vpack.i.b16 %v1069_v12, %v1069_v12  ;;  %v1339_v20 = vpack.i.b16 %v1071_v17, %v1071_v17 }
 0x2f7   : > { %3130 = vmatmul.mubr.msk.bf16.vlgmr.msra.gmra.mxu0 %vm1087_vm2, %v1292_v62  ;;  %3115 = vmatprep.subr.bf16.mxu1 %v4063_v0  ;;  %v1394_v7 = vrot.slane %v2894_v4, %v4444_v50  ;;  %v1441_v25 = vpack.i.b16 %v1073_v24, %v1073_v24 }
 0x2f8   : > { %3140 = vmatpush3.bf16.msra.mxu0 %v1399_v63  ;;  %3141 = vmatprep.mubr.msk.bf16.mxu0 %vm4064_vm0, %v4063_v0  ;;  %v1241_v15 = vrot.slane %v1237_v13, %v4444_v50  ;;  %v1343_v22 = vrot.slane %v1339_v20, %v4444_v50 }
 0x2f9   : > { %3151 = vmatprep.subr.bf16.mxu0 %v4063_v0  ;;  %v1445_v26 = vrot.slane %v1441_v25, %v4444_v50 }
 0x2fd   : > { %3112 = vmatmul.mubr.msk.bf16.vlgmr.msra.gmra.mxu1 %vm1087_vm2, %v1139_v5 }
 0x2fe   : > { %3116 = vmatpush3.bf16.msra.mxu1 %v1195_v6  ;;  %3117 = vmatprep.mubr.msk.bf16.mxu1 %vm4064_vm0, %v4063_v0 }
 0x2ff   : > { %3142 = vmatmul.mubr.msk.bf16.vlgmr.msra.gmra.mxu0 %vm1087_vm2, %v1394_v7  ;;  %3121 = vmatprep.subr.bf16.mxu1 %v4063_v0 }
 0x300   : > { %3167 = vmatprep.mubr.msk.bf16.mxu0 %vm4064_vm0, %v4063_v0  ;;  %3152 = vmatpush3.bf16.msra.mxu0 %v3440_v29 }
 0x301   : > { %3153 = vmatprep.subr.bf16.mxu0 %v4063_v0 }
 0x304   : > { %3154 = vmatpush3.bf16.msra.mxu0 %v3442_v31 }
 0x305   : > { %3118 = vmatmul.mubr.msk.bf16.vlgmr.msra.gmra.mxu1 %vm1087_vm2, %v1190_v10  ;;  %3155 = vmatprep.subr.bf16.mxu0 %v4063_v0 }
 0x306   : > { %3122 = vmatpush3.bf16.msra.mxu1 %v1246_v11  ;;  %3123 = vmatprep.mubr.msk.bf16.mxu1 %vm4064_vm0, %v4063_v0 }
 0x307   : > { %3133 = vmatprep.subr.bf16.mxu1 %v4063_v0 }
 0x308   : > { %3156 = vmatpush3.bf16.msra.mxu0 %v3444_v33 }
 0x309   : > { %3157 = vmatprep.subr.bf16.mxu0 %v4063_v0 }
 0x30c   : > { %3158 = vmatpush3.bf16.msra.mxu0 %v3446_v35 }
 0x30d   : > { %3124 = vmatmul.mubr.msk.bf16.vlgmr.msra.gmra.mxu1 %vm1087_vm2, %v1241_v15  ;;  %3159 = vmatprep.subr.bf16.mxu0 %v4063_v0 }
 0x30e   : > { %3134 = vmatpush3.bf16.msra.mxu1 %v1348_v16  ;;  %3135 = vmatprep.mubr.msk.bf16.mxu1 %vm4064_vm0, %v4063_v0 }
 0x30f   : > { %3145 = vmatprep.subr.bf16.mxu1 %v4063_v0 }
 0x310   : > { %3160 = vmatpush3.bf16.msra.mxu0 %v3448_v37 }
 0x311   : > { %3161 = vmatprep.subr.bf16.mxu0 %v4063_v0 }
 0x314   : > { %3162 = vmatpush3.bf16.msra.mxu0 %v3450_v39 }
 0x315   : > { %3136 = vmatmul.mubr.msk.bf16.vlgmr.msra.gmra.mxu1 %vm1087_vm2, %v1343_v22  ;;  %3163 = vmatprep.subr.bf16.mxu0 %v4063_v0 }
 0x316   : > { %3146 = vmatpush3.bf16.msra.mxu1 %v1450_v23  ;;  %3147 = vmatprep.mubr.msk.bf16.mxu1 %vm4064_vm0, %v4063_v0 }
 0x317   : > { %3171 = vmatprep.subr.bf16.mxu1 %v4063_v0 }
 0x318   : > { %3164 = vmatpush3.bf16.msra.mxu0 %v3452_v41 }
 0x319   : > { %3165 = vmatprep.subr.bf16.mxu0 %v4063_v0 }
 0x31c   : > { %3166 = vmatpush3.bf16.msra.mxu0 %v3453_v42 }
 0x31d   : > { %3148 = vmatmul.mubr.msk.bf16.vlgmr.msra.gmra.mxu1 %vm1087_vm2, %v1445_v26  ;;  %1934 = vmatprep.subr.bf16.mxu0 %v3456_v43 }
 0x31e   : > { %3187 = vmatprep.mubr.msk.bf16.mxu1 %vm4064_vm0, %v4063_v0  ;;  %3172 = vmatpush3.bf16.msra.mxu1 %v3438_v27 }
 0x31f   : > { %3173 = vmatprep.subr.bf16.mxu1 %v4063_v0 }
 0x322   : > { %3174 = vmatpush3.bf16.msra.mxu1 %v3439_v28 }
 0x323   : > { %3175 = vmatprep.subr.bf16.mxu1 %v4063_v0 }
 0x326   : > { %3176 = vmatpush3.bf16.msra.mxu1 %v3441_v30 }
 0x327   : > { %3177 = vmatprep.subr.bf16.mxu1 %v4063_v0 }
 0x32a   : > { %3178 = vmatpush3.bf16.msra.mxu1 %v3443_v32 }
 0x32b   : > { %3179 = vmatprep.subr.bf16.mxu1 %v4063_v0 }
 0x32e   : > { %3180 = vmatpush3.bf16.msra.mxu1 %v3445_v34 }
 0x32f   : > { %3181 = vmatprep.subr.bf16.mxu1 %v4063_v0 }
 0x332   : > { %3182 = vmatpush3.bf16.msra.mxu1 %v3447_v36 }
 0x333   : > { %3183 = vmatprep.subr.bf16.mxu1 %v4063_v0 }
 0x336   : > { %3184 = vmatpush3.bf16.msra.mxu1 %v3449_v38 }
 0x337   : > { %3185 = vmatprep.subr.bf16.mxu1 %v4063_v0 }
 0x33a   : > { %3186 = vmatpush3.bf16.msra.mxu1 %v3451_v40 }
 0x33b   : > { %3191 = vmatprep.subr.bf16.mxu1 %v4063_v0 }
 0x33d   : > { %3188 = vmatmul.mubr.bf16.vlgmr.msra.gmra.mxu1 %v4420_v19  ;;  %v3469_v19 = vld [vmem:[#allocation19 + $0x68] ss:$12 sps:$4 sm:$0xff]  }
 0x33e   : > { %3207 = vmatprep.mubr.msk.bf16.mxu1 %vm4064_vm0, %v4063_v0  ;;  %3192 = vmatpush3.bf16.msra.mxu1 %v3457_v45 }
 0x33f   : > { %3193 = vmatprep.subr.bf16.mxu1 %v4063_v0 }
 0x342   : > { %3194 = vmatpush3.bf16.msra.mxu1 %v3461_v46 }
 0x343   : > { %3195 = vmatprep.subr.bf16.mxu1 %v4063_v0 }
 0x346   : > { %3196 = vmatpush3.bf16.msra.mxu1 %v3465_v47 }
 0x347   : > { %3197 = vmatprep.subr.bf16.mxu1 %v4063_v0 }
 0x34a   : > { %3198 = vmatpush3.bf16.msra.mxu1 %v3469_v19 }
 0x34b   : > { %3199 = vmatprep.subr.bf16.mxu1 %v4063_v0 }
 0x34e   : > { %3200 = vmatpush3.bf16.msra.mxu1 %v3473_v48 }
 0x34f   : > { %3201 = vmatprep.subr.bf16.mxu1 %v4063_v0 }
 0x352   : > { %3202 = vmatpush3.bf16.msra.mxu1 %v3477_v49 }
 0x353   : > { %3203 = vmatprep.subr.bf16.mxu1 %v4063_v0 }
 0x3b5   : > { %v1129_v51 = vpop.f32.mrf.mxu1 }
 0x3b6   : > { %v1508_v17 = vpack.c.bf16 %v1129_v51, %v1129_v51 }
 0x3b7   : > { %v3107_v52 = vpop.f32.mrf.mxu1  ;;  %v1333_v53 = vpop.f32.mrf.mxu0 }
 0x3b8   : > { %v1512_v21 = vpack.c.bf16 %v1333_v53, %v1333_v53  ;;  %v1540_v27 = vunpack.c.l.b16 %v1508_v17  ;;  %v3454_v53 = vld [vmem:[#allocation19 + $0xa8] ss:$12 sps:$4 sm:$0xff]  }
 0x3b9   : > { %v1132_v54 = vpop.f32.mrf.mxu1  ;;  %v3131_v55 = vpop.f32.mrf.mxu0 }
 0x3ba   : > { %v1544_v30 = vunpack.c.l.b16 %v1512_v21  ;;  %v3460_v55 = vld [vmem:[#allocation19 + $0x94] ss:$12 sps:$4 sm:$0xff]  }
 0x3bb   : > { %v3108_v56 = vpop.f32.mrf.mxu1  ;;  %v1336_v57 = vpop.f32.mrf.mxu0 }
 0x3bc   : > { %v1557_v38 = vrot.slane %v1544_v30, 4  ;;  %v3458_v56 = vld [vmem:[#allocation19 + $0x90] ss:$12 sps:$4 sm:$0xff]  }
 0x3bd   : > { %v1180_v58 = vpop.f32.mrf.mxu1  ;;  %v3132_v59 = vpop.f32.mrf.mxu0  ;;  %v3464_v57 = vld [vmem:[#allocation19 + $0x7c] ss:$12 sps:$4 sm:$0xff]  }
 0x3be   : > { %v1509_v9 = vpack.c.bf16 %v1180_v58, %v1180_v58  ;;  %v3462_v58 = vld [vmem:[#allocation19 + $0x78] ss:$12 sps:$4 sm:$0xff]   ;;  %v3494_v30 = vld [vmem:[#allocation20 + $0x7c] ss:$12 sps:$4 sm:$0xff]  }
 0x3bf   : > { %v3113_v60 = vpop.f32.mrf.mxu1  ;;  %v1435_v61 = vpop.f32.mrf.mxu0  ;;  %v3468_v59 = vld [vmem:[#allocation19 + $0x64] ss:$12 sps:$4 sm:$0xff]  }
 0x3c0   : > { %v1541_v14 = vunpack.c.l.b16 %v1509_v9  ;;  %v1514_v31 = vpack.c.bf16 %v1435_v61, %v1435_v61  ;;  %v3466_v60 = vld [vmem:[#allocation19 + $0x60] ss:$12 sps:$4 sm:$0xff]   ;;  %v3484_v9 = vld [vmem:[#allocation19 + $0x4] ss:$12 sps:$4 sm:$0xff]  }
 0x3c1   : > { %v1183_v62 = vpop.f32.mrf.mxu1  ;;  %v3143_v63 = vpop.f32.mrf.mxu0  ;;  %v3472_v61 = vld [vmem:[#allocation19 + $0x4c] ss:$12 sps:$4 sm:$0xff]  }
 0x3c2   : > { %v1548_v23 = vrot.slane %v1541_v14, 7  ;;  %v1546_v39 = vunpack.c.l.b16 %v1514_v31  ;;  %v3470_v62 = vld [vmem:[#allocation19 + $0x48] ss:$12 sps:$4 sm:$0xff]   ;;  %v3492_v31 = vld [vmem:[#allocation20 + $0x78] ss:$12 sps:$4 sm:$0xff]  }
 0x3c3   : > { %v3114_v1 = vpop.f32.mrf.mxu1  ;;  %v1438_v2 = vpop.f32.mrf.mxu0  ;;  %v3476_v63 = vld [vmem:[#allocation19 + $0x34] ss:$12 sps:$4 sm:$0xff]  }
 0x3c4   : > { %v1550_v33 = vsel %vm1549_vm3, %v1548_v23, %v1540_v27  ;;  %v1563_v47 = vrot.slane %v1546_v39, 2  ;;  %v3474_v1 = vld [vmem:[#allocation19 + $0x30] ss:$12 sps:$4 sm:$0xff]   ;;  %v3491_v27 = vld [vmem:[#allocation20 + $0x94] ss:$12 sps:$4 sm:$0xff]  }
 0x3c5   : > { %v1231_v3 = vpop.f32.mrf.mxu1  ;;  %v3144_v4 = vpop.f32.mrf.mxu0  ;;  %v3503_v39 = vld [vmem:[#allocation20 + $0x34] ss:$12 sps:$4 sm:$0xff]  }
 0x3c6   : > { %v1510_v10 = vpack.c.bf16 %v1231_v3, %v1231_v3 }
 0x3c7   : > { %v3119_v5 = vpop.f32.mrf.mxu1 }
 0x3c8   : > { %v1542_v15 = vunpack.c.l.b16 %v1510_v10  ;;  %v3480_v5 = vld [vmem:[#allocation19 + $0x1c] ss:$12 sps:$4 sm:$0xff]   ;;  %v3482_v10 = vld [vmem:[#allocation19] ss:$12 sps:$4 sm:$0xff]  }
 0x3c9   : > { %v1234_v6 = vpop.f32.mrf.mxu1 }
 0x3ca   : > { %v1551_v25 = vrot.slane %v1542_v15, 6  ;;  %v3478_v6 = vld [vmem:[#allocation19 + $0x18] ss:$12 sps:$4 sm:$0xff]   ;;  %v2913_v15 = vld [vmem:[%s4787_s8] ss:$0 sm:$0xff] }
 0x3cb   : > { %v3120_v7 = vpop.f32.mrf.mxu1 }
 0x3cc   : > { %v1553_v34 = vsel %vm1552_vm4, %v1551_v25, %v1550_v33  ;;  %v3510_v25 = vld [vmem:[#allocation20 + $0xb0] ss:$12 sps:$4 sm:$0xff]  }
 0x3cd   : > { %v1282_v8 = vpop.f32.mrf.mxu1  ;;  %v3497_v33 = vld [vmem:[#allocation20 + $0x64] ss:$12 sps:$4 sm:$0xff]  }
 0x3ce   : > { %v1511_v12 = vpack.c.bf16 %v1282_v8, %v1282_v8  ;;  %v3481_v8 = vld [vmem:[#allocation19 + $0x20] ss:$12 sps:$4 sm:$0xff]  }
 0x3cf   : > { %v3125_v11 = vpop.f32.mrf.mxu1  ;;  %3204 = vmatpush3.bf16.msra.mxu1 %v3481_v8  ;;  %v1789_v8 = vld [vmem:[%s4719_s10] sm:$0x7] }
 0x3d0   : > { %v1543_v20 = vunpack.c.l.b16 %v1511_v12  ;;  %3205 = vmatprep.subr.bf16.mxu1 %v4063_v0  ;;  %v3485_v11 = vld [vmem:[#allocation19 + $0x8] ss:$12 sps:$4 sm:$0xff]   ;;  %v3488_v12 = vld [vmem:[#allocation20 + $0xac] ss:$12 sps:$4 sm:$0xff]  }
 0x3d1   : > { %v1285_v13 = vpop.f32.mrf.mxu1 }
 0x3d2   : > { %v1554_v28 = vrot.slane %v1543_v20, 5  ;;  %v4066_v13 = vmov 0  }
 0x3d3   : > { %v3126_v16 = vpop.f32.mrf.mxu1  ;;  %3206 = vmatpush3.bf16.msra.mxu1 %v3485_v11  ;;  %3420 = vset.pattern.permute.xlu1 %v4066_v13 }
 0x3d4   : > { %v1556_v36 = vsel %vm1555_vm5, %v1554_v28, %v1553_v34  ;;  %3211 = vmatprep.subr.bf16.mxu1 %v4063_v0  ;;  %3421 = vset.pattern.permute.xlu0 %v4066_v13  ;;  %v3489_v28 = vld [vmem:[#allocation20 + $0x90] ss:$12 sps:$4 sm:$0xff]   ;;  %v3495_v34 = vld [vmem:[#allocation20 + $0x60] ss:$12 sps:$4 sm:$0xff]  }
 0x3d5   : > { %v1384_v22 = vpop.f32.mrf.mxu1  ;;  %v1559_v42 = vsel %vm1558_vm6, %v1557_v38, %v1556_v36  ;;  %v3500_v36 = vld [vmem:[#allocation20 + $0x4c] ss:$12 sps:$4 sm:$0xff]   ;;  %v3514_v38 = vld [vmem:[#allocation20 + $0x50] ss:$12 sps:$4 sm:$0xff]  }
 0x3d6   : > { %v1513_v24 = vpack.c.bf16 %v1384_v22, %v1384_v22 }
 0x3d7   : > { %v3137_v26 = vpop.f32.mrf.mxu1 }
 0x3d8   : > { %v1545_v29 = vunpack.c.l.b16 %v1513_v24  ;;  %v3486_v24 = vld [vmem:[#allocation20 + $0xa8] ss:$12 sps:$4 sm:$0xff]  }
 0x3d9   : > { %v1387_v32 = vpop.f32.mrf.mxu1 }
 0x3da   : > { %v1560_v37 = vrot.slane %v1545_v29, 3  ;;  %v3511_v29 = vld [vmem:[#allocation20 + $0x98] ss:$12 sps:$4 sm:$0xff]   ;;  %v3512_v32 = vld [vmem:[#allocation20 + $0x80] ss:$12 sps:$4 sm:$0xff]  }
 0x3db   : > { %v3138_v35 = vpop.f32.mrf.mxu1 }
 0x3dc   : > { %v1562_v45 = vsel %vm1561_vm7, %v1560_v37, %v1559_v42  ;;  %v3513_v35 = vld [vmem:[#allocation20 + $0x68] ss:$12 sps:$4 sm:$0xff]  }
 0x3dd   : > { %v1486_v40 = vpop.f32.mrf.mxu1  ;;  %v1565_v49 = vsel %vm1564_vm8, %v1563_v47, %v1562_v45  ;;  %v3498_v37 = vld [vmem:[#allocation20 + $0x48] ss:$12 sps:$4 sm:$0xff]   ;;  %v3516_v45 = vld [vmem:[#allocation20 + $0x20] ss:$12 sps:$4 sm:$0xff]  }
 0x3de   : > { %v1515_v41 = vpack.c.bf16 %v1486_v40, %v1486_v40  ;;  %v3501_v40 = vld [vmem:[#allocation20 + $0x30] ss:$12 sps:$4 sm:$0xff]   ;;  %v3507_v47 = vld [vmem:[#allocation20] ss:$12 sps:$4 sm:$0xff]  }
 0x3df   : > { %v3149_v43 = vpop.f32.mrf.mxu1  ;;  %v3506_v42 = vld [vmem:[#allocation20 + $0x1c] ss:$12 sps:$4 sm:$0xff]  }
 0x3e0   : > { %v1547_v46 = vunpack.c.l.b16 %v1515_v41  ;;  %v3515_v41 = vld [vmem:[#allocation20 + $0x38] ss:$12 sps:$4 sm:$0xff]  }
 0x3e1   : > { %v1489_v19 = vpop.f32.mrf.mxu1  ;;  %v3504_v43 = vld [vmem:[#allocation20 + $0x18] ss:$12 sps:$4 sm:$0xff]  }
 0x3e2   : > { %v1566_v48 = vrot.slane %v1547_v46, 1  ;;  %v3509_v46 = vld [vmem:[#allocation20 + $0x4] ss:$12 sps:$4 sm:$0xff]   ;;  %v3517_v19 = vld [vmem:[#allocation20 + $0x8] ss:$12 sps:$4 sm:$0xff]  }
 0x3e3   : > { %v3150_v51 = vpop.f32.mrf.mxu1 }
 0x3e4   : > { %v1568_v52 = vsel %vm1567_vm9, %v1566_v48, %v1565_v49  ;;  %v3520_v48 = vld [vmem:[%s4392_s20 + $0x74] ss:$8 sps:$4 sm:$0xff]   ;;  %v3518_v49 = vld [vmem:[%s4392_s20 + $0x70] ss:$8 sps:$4 sm:$0xff]   ;;  %v3523_v51 = vld [vmem:[%s4392_s20 + $0x64] ss:$8 sps:$4 sm:$0xff]  }
 0x3e5   : > { %v1569_v54 = vpack.c.b16 %v1568_v52, %v1568_v52  ;;  %v3521_v52 = vld [vmem:[%s4392_s20 + $0x60] ss:$8 sps:$4 sm:$0xff]  }
 0x3e7   : > { %3168 = vmatmul.mubr.bf16.vlgmr.msra.gmra.mxu0 %v1569_v54  ;;  %v3527_v54 = vld [vmem:[%s4392_s20 + $0x40] ss:$8 sps:$4 sm:$0xff]  }
 0x3e8   : > { %1935 = vmatpush1.bf16.msra.mxu0 %v3454_v53  ;;  %1966 = vmatprep.mubr.bf16.mxu0 %v4066_v13  ;;  %v3524_v53 = vld [vmem:[%s4392_s20 + $0x50] ss:$8 sps:$4 sm:$0xff]  }
 0x3e9   : > { %1936 = vmatprep.subr.bf16.mxu0 %v3460_v55  ;;  %v3532_v55 = vld [vmem:[%s4392_s20 + $0x34] ss:$8 sps:$4 sm:$0xff]  }
 0x3ec   : > { %1937 = vmatpush1.bf16.msra.mxu0 %v3458_v56  ;;  %v3530_v56 = vld [vmem:[%s4392_s20 + $0x30] ss:$8 sps:$4 sm:$0xff]  }
 0x3ed   : > { %1938 = vmatprep.subr.bf16.mxu0 %v3464_v57  ;;  %v3535_v57 = vld [vmem:[%s4392_s20 + $0x24] ss:$8 sps:$4 sm:$0xff]  }
 0x3f0   : > { %1939 = vmatpush1.bf16.msra.mxu0 %v3462_v58  ;;  %v3533_v58 = vld [vmem:[%s4392_s20 + $0x20] ss:$8 sps:$4 sm:$0xff]  }
 0x3f1   : > { %1940 = vmatprep.subr.bf16.mxu0 %v3468_v59  ;;  %v3538_v59 = vld [vmem:[%s4392_s20 + $0x14] ss:$8 sps:$4 sm:$0xff]  }
 0x3f4   : > { %1941 = vmatpush1.bf16.msra.mxu0 %v3466_v60  ;;  %v3536_v60 = vld [vmem:[%s4392_s20 + $0x10] ss:$8 sps:$4 sm:$0xff]  }
 0x3f5   : > { %1942 = vmatprep.subr.bf16.mxu0 %v3472_v61  ;;  %v3541_v61 = vld [vmem:[%s4392_s20 + $0x4] ss:$8 sps:$4 sm:$0xff]  }
 0x3f8   : > { %1943 = vmatpush1.bf16.msra.mxu0 %v3470_v62  ;;  %v3539_v62 = vld [vmem:[%s4392_s20] ss:$8 sps:$4 sm:$0xff]  }
 0x3f9   : > { %1944 = vmatprep.subr.bf16.mxu0 %v3476_v63 }
 0x3fc   : > { %1945 = vmatpush1.bf16.msra.mxu0 %v3474_v1 }
 0x3fd   : > { %v1741_v2 = vpop.f32.mrf.mxu1  ;;  %1946 = vmatprep.subr.bf16.mxu0 %v3480_v5 }
 0x3ff   : > { %v3189_v3 = vpop.f32.mrf.mxu1 }
 0x400   : > { %1947 = vmatpush1.bf16.msra.mxu0 %v3478_v6 }
 0x401   : > { %v1744_v4 = vpop.f32.mrf.mxu1  ;;  %1948 = vmatprep.subr.bf16.mxu0 %v3484_v9  ;;  %v2047_v9 = vld [vmem:[%s4721_s12] sm:$0x7] }
 0x402   : > { %v2052_v11 = vrot.slane %v2047_v9, %v4444_v50 }
 0x403   : > { %v3190_v7 = vpop.f32.mrf.mxu1 }
 0x404   : > { %1949 = vmatpush1.bf16.msra.mxu0 %v3482_v10  ;;  %v1794_v10 = vrot.slane %v1789_v8, %v4444_v50 }
 0x405   : > { %2192 = vmatprep.subr.bf16.mxu0 %v3488_v12  ;;  %v4560_v12 = vsub.s32 1, %v4434_v44 }
 0x4a7   : > { %v1653_v14 = vpop.f32.mrf.mxu0 }
 0x4a8   : > { %v1742_v16 = vadd.f32 %v1741_v2, %v1653_v14 }
 0x4a9   : > { %v3169_v17 = vpop.f32.mrf.mxu0 }
 0x4aa   : > { %v1754_v20 = vadd.f32 %v2913_v15, %v1742_v16  ;;  %v2056_v17 = vrot.slane %v2047_v9, %v4560_v12 }
 0x4ab   : > { %v1656_v21 = vpop.f32.mrf.mxu0 }
 0x4ac   : > { %v1755_v22 = vmax.f32 %v1754_v20, 0.0 }
 0x4ad   : > { %v3170_v23 = vpop.f32.mrf.mxu0 }
 0x4ae   : > { %v1756_v26 = vpack.c.bf16 %v1755_v22, %v1755_v22  ;;  %v1798_v22 = vrot.slane %v1789_v8, %v4560_v12 }
 0x4b0   : > { %1967 = vmatmul.mubr.bf16.vlgmr.msra.gmra.mxu0 %v1756_v26  ;;  %3208 = vmatmul.mubr.bf16.vlgmr.msra.gmra.mxu1 %v1756_v26 }
 0x4b1   : > { %2193 = vmatpush1.bf16.msra.mxu0 %v3486_v24  ;;  %3212 = vmatpush3.bf16.msra.mxu1 %v3510_v25 }
 0x4b2   : > { %2194 = vmatprep.subr.bf16.mxu0 %v3491_v27  ;;  %2224 = vmatprep.mubr.bf16.mxu0 %v4066_v13 }
 0x4b3   : > { %3213 = vmatprep.subr.bf16.mxu1 %v4063_v0  ;;  %3227 = vmatprep.mubr.msk.bf16.mxu1 %vm4064_vm0, %v4063_v0 }
 0x4b5   : > { %2195 = vmatpush1.bf16.msra.mxu0 %v3489_v28  ;;  %3214 = vmatpush3.bf16.msra.mxu1 %v3511_v29 }
 0x4b6   : > { %2196 = vmatprep.subr.bf16.mxu0 %v3494_v30  ;;  %3215 = vmatprep.subr.bf16.mxu1 %v4063_v0 }
 0x4b9   : > { %2197 = vmatpush1.bf16.msra.mxu0 %v3492_v31  ;;  %3216 = vmatpush3.bf16.msra.mxu1 %v3512_v32 }
 0x4ba   : > { %2198 = vmatprep.subr.bf16.mxu0 %v3497_v33  ;;  %3217 = vmatprep.subr.bf16.mxu1 %v4063_v0 }
 0x4bd   : > { %2199 = vmatpush1.bf16.msra.mxu0 %v3495_v34  ;;  %3218 = vmatpush3.bf16.msra.mxu1 %v3513_v35  ;;  %v1801_v35 = vsub.s32 2, %v4434_v44 }
 0x4be   : > { %2200 = vmatprep.subr.bf16.mxu0 %v3500_v36  ;;  %3219 = vmatprep.subr.bf16.mxu1 %v4063_v0 }
 0x4bf   : > { %v2060_v36 = vrot.slane %v2047_v9, %v1801_v35 }
 0x4c1   : > { %2201 = vmatpush1.bf16.msra.mxu0 %v3498_v37  ;;  %3220 = vmatpush3.bf16.msra.mxu1 %v3514_v38  ;;  %v1802_v38 = vrot.slane %v1789_v8, %v1801_v35 }
 0x4c2   : > { %2202 = vmatprep.subr.bf16.mxu0 %v3503_v39  ;;  %3221 = vmatprep.subr.bf16.mxu1 %v4063_v0 }
 0x4c5   : > { %2203 = vmatpush1.bf16.msra.mxu0 %v3501_v40  ;;  %3222 = vmatpush3.bf16.msra.mxu1 %v3515_v41 }
 0x4c6   : > { %2204 = vmatprep.subr.bf16.mxu0 %v3506_v42  ;;  %3223 = vmatprep.subr.bf16.mxu1 %v4063_v0 }
 0x4c9   : > { %2205 = vmatpush1.bf16.msra.mxu0 %v3504_v43  ;;  %3224 = vmatpush3.bf16.msra.mxu1 %v3516_v45 }
 0x4ca   : > { %2206 = vmatprep.subr.bf16.mxu0 %v3509_v46  ;;  %3225 = vmatprep.subr.bf16.mxu1 %v4063_v0  ;;  %v3526_v0 = vld [vmem:[%s4392_s20 + $0x54] ss:$8 sps:$4 sm:$0xff]  }
 0x4cd   : > { %2207 = vmatpush1.bf16.msra.mxu0 %v3507_v47  ;;  %3226 = vmatpush3.bf16.msra.mxu1 %v3517_v19 }
 0x4ce   : > { %2408 = vmatprep.subr.bf16.mxu0 %v3520_v48  ;;  %v3564_v48 = vld [vmem:[#allocation8] sm:$0xff] }
 0x4d0   : > { %2225 = vmatmul.mubr.bf16.vlgmr.msra.gmra.mxu0 %v4418_v18  ;;  %3228 = vmatmul.mubr.bf16.vlgmr.msra.gmra.mxu1 %v4418_v18  ;;  %v3529_v18 = vld [vmem:[%s4392_s20 + $0x44] ss:$8 sps:$4 sm:$0xff]   ;;  %s4789_s20 = sld [smem:[#allocation50_spill]] }
 0x4d1   : > { %2440 = vmatprep.mubr.bf16.mxu0 %v4066_v13  ;;  %2409 = vmatpush1.bf16.msra.mxu0 %v3518_v49 }
 0x4d2   : > { %2410 = vmatprep.subr.bf16.mxu0 %v3523_v51 }
 0x4d5   : > { %2411 = vmatpush1.bf16.msra.mxu0 %v3521_v52 }
 0x4d6   : > { %2412 = vmatprep.subr.bf16.mxu0 %v3526_v0  ;;  %s801_s18 = scalar_lea.vmem %s4789_s20, %s4807_s14  ;;  %s2516_s20 = scalar_lea.hbm %s4790_s9, %s2992_s26 }
 0x4d9   : > { %2413 = vmatpush1.bf16.msra.mxu0 %v3524_v53  ;;  %v2316_v53 = vld [vmem:[%s801_s18] sm:$0x3]  ;;  %s2488_s18 = scalar_lea.sflag [#allocation7], %s4387_s6 }
 0x4da   : > { %2414 = vmatprep.subr.bf16.mxu0 %v3529_v18  ;;  %v2321_v18 = vrot.slane %v2316_v53, %v4444_v50 }
 0x4dd   : > { %2415 = vmatpush1.bf16.msra.mxu0 %v3527_v54  ;;  %v2325_v54 = vrot.slane %v2316_v53, %v4560_v12 }
 0x4de   : > { %2416 = vmatprep.subr.bf16.mxu0 %v3532_v55 }
 0x4e1   : > { %2417 = vmatpush1.bf16.msra.mxu0 %v3530_v56 }
 0x4e2   : > { %2418 = vmatprep.subr.bf16.mxu0 %v3535_v57 }
 0x4e5   : > { %2419 = vmatpush1.bf16.msra.mxu0 %v3533_v58 }
 0x4e6   : > { %2420 = vmatprep.subr.bf16.mxu0 %v3538_v59 }
 0x4e9   : > { %2421 = vmatpush1.bf16.msra.mxu0 %v3536_v60 }
 0x4ea   : > { %2422 = vmatprep.subr.bf16.mxu0 %v3541_v61 }
 0x4ed   : > { %2423 = vmatpush1.bf16.msra.mxu0 %v3539_v62 }
 0x570   : > { %v1968_v63 = vpop.f32.mrf.mxu0  ;;  %v2009_v1 = vpop.f32.mrf.mxu1 }
 0x571   : > { %v1969_v15 = vadd.f32 %v1968_v63, %v1794_v10  ;;  %v2010_v42 = vadd.f32 %v2009_v1, %v1802_v38 }
 0x572   : > { %v1970_v2 = vpop.f32.mrf.mxu0  ;;  %v3209_v3 = vpop.f32.mrf.mxu1 }
 0x573   : > { %v1971_v30 = vadd.f32 %v1970_v2, %v1798_v22 }
 0x574   : > { %v1972_v4 = vpop.f32.mrf.mxu0  ;;  %v2012_v5 = vpop.f32.mrf.mxu1 }
 0x576   : > { %v1973_v6 = vpop.f32.mrf.mxu0  ;;  %v3210_v7 = vpop.f32.mrf.mxu1 }
 0x590   : > { %v2226_v13 = vpop.f32.mrf.mxu0  ;;  %v2267_v14 = vpop.f32.mrf.mxu1 }
 0x591   : > { %v2227_v16 = vadd.f32 %v2226_v13, %v2052_v11  ;;  %v2268_v40 = vadd.f32 %v2267_v14, %v2060_v36 }
 0x592   : > { %v2228_v20 = vpop.f32.mrf.mxu0  ;;  %v3229_v21 = vpop.f32.mrf.mxu1 }
 0x593   : > { %v2273_v23 = vadd.f32 %v2227_v16, %v1969_v15  ;;  %v2229_v27 = vadd.f32 %v2228_v20, %v2056_v17 }
 0x594   : > { %v2230_v24 = vpop.f32.mrf.mxu0  ;;  %v2270_v25 = vpop.f32.mrf.mxu1 }
 0x595   : > { %v2962_v26 = vmul.f32 -1.442695, %v2273_v23  ;;  %v2280_v31 = vadd.f32 %v2229_v27, %v1971_v30 }
 0x596   : > { %v2231_v28 = vpop.f32.mrf.mxu0  ;;  %v3230_v29 = vpop.f32.mrf.mxu1 }
 0x597   : > { %3546 = vpow2.f32 %v2962_v26  ;;  %v2963_v32 = vmul.f32 -1.442695, %v2280_v31 }
 0x599   : > { %3548 = vpow2.f32 %v2963_v32 }
 0x5a4   : > { %v3547_v33 = vpop.eup %3546 }
 0x5a5   : > { %v2277_v34 = vadd.f32 1.0, %v3547_v33 }
 0x5a6   : > { %v3549_v37 = vpop.eup %3548 }
 0x5a7   : > { %3550 = vrcp.f32 %v2277_v34  ;;  %v2284_v39 = vadd.f32 1.0, %v3549_v37 }
 0x5a9   : > { %3552 = vrcp.f32 %v2284_v39 }
 0x5b4   : > { %v3551_v41 = vpop.eup %3550 }
 0x5b5   : > { %v2287_v43 = vmul.f32 %v3551_v41, %v2268_v40 }
 0x5b6   : > { %v3553_v46 = vpop.eup %3552 }
 0x5b7   : > { %v2288_v45 = vadd.f32 %v2287_v43, %v2010_v42  ;;  %v2290_v47 = vsub.f32 1.0, %v3553_v46  ;;  %v2292_v44 = vmul.f32 %v3564_v48, %v3553_v46 }
 0x5b9   : > { %3554 = vtanh.f32 %v2288_v45 }
 0x5c6   : > { %v3555_v19 = vpop.eup %3554 }
 0x5c7   : > { %v2291_v49 = vmul.f32 %v3555_v19, %v2290_v47 }
 0x5c9   : > { %v2293_v51 = vadd.f32 %v2292_v44, %v2291_v49 }
 0x5cb   : > { %v2295_v52 = vpack.c.bf16 %v2293_v51, %v2293_v51  ;;  %2294 = vst [vmem:[%s4737_s23] sm:$0xff] %v2293_v51  ;;  %s3857_s23 = sshll.u32 %s4067_s4, 4  ;;  %s3858_s23 = int_to_ptr.vmem [resolvable:$false] %s3857_s23 }
 0x5cc   : > { %s3859_s25 = scalar_lea.vmem %s3858_s23, 512  ;;  %p3860_p9 = scmp.lt.s32.totalorder %s2519_s3, %s3858_s23 }
 0x5cd   : > { %2296 = vst [vmem:[#allocation2] sm:$0xf] %v2295_v52  ;;  %p3861_p1 = scmp.lt.s32.totalorder %s3859_s25, %s3853_s22 }
 0x5cf   : > { %p3862_p6 = por %p3861_p1, %p3860_p9 }
 0x5d1   : > { %p3863_p10 = pnand %p3862_p6, %p3856_p4 }
 0x5d4   : > { %v2299_v0 = vld [vmem:[#allocation2] sm:$0xf] }
 0x5d5   : > { %2441 = vmatmul.mubr.bf16.vlgmr.msra.gmra.mxu0 %v2299_v0 }
 0x695   : > { %v2442_v55 = vpop.f32.mrf.mxu0 }
 0x696   : > { %v2443_v56 = vadd.f32 %v2442_v55, %v2321_v18 }
 0x697   : > { %v2444_v57 = vpop.f32.mrf.mxu0 }
 0x698   : > { %2449 = vst [vmem:[%s773_s2] sm:$0xff] %v2443_v56  ;;  %v2445_v58 = vadd.f32 %v2444_v57, %v2325_v54 }
 0x699   : > { %v2446_v59 = vpop.f32.mrf.mxu0 }
 0x69a   : > { %2450 = vst [vmem:[%s773_s2 + $0x8] sm:$0xff] %v2445_v58  ;;  %v2451_v60 = vmax.f32 %v2443_v56, %v2445_v58 }
 0x69b   : > { %v2447_v61 = vpop.f32.mrf.mxu0 }
 0x69c   : > { %2452 = vmax.xlane.f32.xlu1 %v2451_v60 }
 0x725   : > { %v4575_v62 = vpop.xlane.xlu1 %2452 }
 0x726   : > { %2463 = vperm.xlu1 %3420, %v4575_v62  }
 0x7a1   : > { %v2464_v50 = vpop.permute.xlu1 %2463 }
 0x7a2   : > { %v2466_v63 = vsub.f32 %v2443_v56, %v2464_v50  ;;  %v2467_v1 = vsub.f32 %v2445_v58, %v2464_v50 }
 0x7a4   : > { %v2468_v2 = vmul.f32 1.442695, %v2466_v63  ;;  %v2470_v3 = vmul.f32 1.442695, %v2467_v1 }
 0x7a6   : > { %3556 = vpow2.f32 %v2468_v2 }
 0x7a7   : > { %3558 = vpow2.f32 %v2470_v3 }
 0x7b3   : > { %v3557_v4 = vpop.eup %3556 }
 0x7b4   : > { %v3559_v5 = vpop.eup %3558 }
 0x7b5   : > { %v2472_v6 = vadd.f32 %v3559_v5, %v3557_v4 }
 0x7b7   : > { %2473 = vadd.xlane.f32.xlu0 %v2472_v6 }
 0x7b8   : > { %3866 = shalt.err (!%p3863_p10)
}
 0x7b9   : > { %s3867_s5 = scalar_lea.hbm %s2516_s20, 256  ;;  %s3871_s14 = scalar_lea.hbm %s4790_s9, 512 }
 0x7ba   : > { %p3868_p11 = scmp.ne.s32.totalorder %s2516_s20, %s3867_s5  ;;  %p3872_p5 = scmp.lt.s32.totalorder %s2516_s20, %s4790_s9 }
 0x7bb   : > { %p3873_p12 = scmp.lt.s32.totalorder %s3871_s14, %s3867_s5 }
 0x7bc   : > { %p3869_p0 = pnand %p3868_p11, %p4329_p13 }
 0x7bd   : > { %p3874_p7 = por %p3873_p12, %p3872_p5 }
 0x7be   : > { %p3870_p8 = pneg %p3869_p0 }
 0x7c0   : > { %p3875_p3 = pnand %p3874_p7, %p3870_p8 }
 0x7c2   : > { %3878 = shalt.err (!%p3875_p3)
}
 0x7c3   : > { %3273 = dma.vmem_to_hbm [thread:$0]  (%p4329_p13), %s2519_s3, 256, %s2516_s20, %s2488_s18  }
 0x7c4   : > { %s4791_s23 = sld [smem:[#allocation54_spill]]  ;;  %s4792_s2 = scalar_lea.vmem [#allocation27], %s4437_s17 }
 0x7c5   : > { %s2557_s26 = sshll.u32 %s4792_s2, 4  ;;  %s2503_s8 = scalar_lea.sflag [#allocation28], %s4387_s6  ;;  %s2558_s26 = int_to_ptr.vmem [resolvable:$true] %s2557_s26 }
 0x7c6   : > { %s3879_s7 = scalar_lea.vmem %s2558_s26, 128  ;;  %s4068_s5 = smov [#allocation27]  }
 0x7c7   : > { %p3880_p4 = scmp.ne.s32.totalorder %s2558_s26, %s3879_s7  ;;  %s3883_s14 = sshll.u32 %s4068_s5, 4  ;;  %s3884_s14 = int_to_ptr.vmem [resolvable:$false] %s3883_s14 }
 0x7c8   : > { %s3885_s9 = scalar_lea.vmem %s3884_s14, 256  ;;  %p3886_p6 = scmp.lt.s32.totalorder %s2558_s26, %s3884_s14 }
 0x7c9   : > { %p3881_p9 = pnand %p3880_p4, %p4329_p13  ;;  %p3887_p10 = scmp.lt.s32.totalorder %s3885_s9, %s3879_s7 }
 0x7ca   : > { %s2555_s22 = scalar_lea.hbm %s4791_s23, %s4579_s24 }
 0x7cb   : > { %p3882_p1 = pneg %p3881_p9  ;;  %p3888_p11 = por %p3887_p10, %p3886_p6 }
 0x7cd   : > { %p3889_p0 = pnand %p3888_p11, %p3882_p1 }
 0x7cf   : > { %3892 = shalt.err (!%p3889_p0)
}
 0x7d0   : > { %s3893_s3 = scalar_lea.hbm %s2555_s22, 128  ;;  %s3897_s18 = scalar_lea.hbm %s4791_s23, 256 }
 0x7d1   : > { %p3894_p8 = scmp.ne.s32.totalorder %s2555_s22, %s3893_s3  ;;  %p3898_p7 = scmp.lt.s32.totalorder %s2555_s22, %s4791_s23 }
 0x7d2   : > { %p3899_p3 = scmp.lt.s32.totalorder %s3897_s18, %s3893_s3 }
 0x7d3   : > { %p3895_p5 = pnand %p3894_p8, %p4329_p13 }
 0x7d4   : > { %p3900_p4 = por %p3899_p3, %p3898_p7 }
 0x7d5   : > { %p3896_p12 = pneg %p3895_p5 }
 0x7d7   : > { %p3901_p9 = pnand %p3900_p4, %p3896_p12 }
 0x7d9   : > { %3904 = shalt.err (!%p3901_p9)
}
 0x7da   : > { %3276 = dma.vmem_to_hbm [thread:$0]  (%p4329_p13), %s2558_s26, 128, %s2555_s22, %s2503_s8   ;;  %v2457_v7 = vsub.f32 -inf, %v4575_v62 }
 0x7db   : > { %s780_s9 = scalar_lea.vmem [#allocation24], %s4437_s17  ;;  %s4793_s7 = scalar_lea.vmem [#allocation26], %s4437_s17 }
 0x7dc   : > { %v2458_v8 = vmul.f32 1.442695, %v2457_v7  ;;  %s2531_s2 = sshll.u32 %s780_s9, 4  ;;  %s2544_s5 = sshll.u32 %s4793_s7, 4  ;;  %s4628_s2 = int_to_ptr.vmem [resolvable:$true] %s2531_s2  ;;  %s4636_s5 = int_to_ptr.vmem [resolvable:$true] %s2544_s5 }
 0x7dd   : > { %s4794_s8 = sld [smem:[#allocation52_spill]]  ;;  %s4796_s17 = sand.u32 1, %s4197_s1  }
 0x7de   : > { %3560 = vpow2.f32 %v2458_v8  ;;  %s4795_s20 = sld [smem:[#allocation53_spill]]  ;;  %s4640_s4 = scalar_lea.sflag [#allocation25], %s4796_s17 }
 0x7df   : > { %s3905_s25 = scalar_lea.vmem %s4628_s2, 128  ;;  %s4069_s7 = smov [#allocation24]  }
 0x7e0   : > { %p3906_p1 = scmp.ne.s32.totalorder %s4628_s2, %s3905_s25  ;;  %s3909_s22 = sshll.u32 %s4069_s7, 4  ;;  %s3910_s22 = int_to_ptr.vmem [resolvable:$false] %s3909_s22 }
 0x7e1   : > { %s3911_s26 = scalar_lea.vmem %s3910_s22, 256  ;;  %p3912_p11 = scmp.lt.s32.totalorder %s4628_s2, %s3910_s22 }
 0x7e2   : > { %p3907_p6 = pnand %p3906_p1, %p4329_p13  ;;  %p3913_p0 = scmp.lt.s32.totalorder %s3911_s26, %s3905_s25 }
 0x7e3   : > { %s4626_s14 = scalar_lea.hbm %s4794_s8, %s4579_s24 }
 0x7e4   : > { %s4634_s18 = scalar_lea.hbm %s4795_s20, %s4579_s24  ;;  %p3908_p10 = pneg %p3907_p6 }
 0x7e5   : > { %p3914_p8 = por %p3913_p0, %p3912_p11 }
 0x7e7   : > { %p3915_p5 = pnand %p3914_p8, %p3908_p10 }
 0x7eb   : > { %v3561_v9 = vpop.eup %3560 }
 0x7ec   : > { %v2460_v10 = vmul.f32 0.0, %v3561_v9 }
 0x840   : > { %v2474_v11 = vpop.xlane.xlu0 %2473 }
 0x841   : > { %v2475_v12 = vadd.f32 %v2474_v11, %v2460_v10 }
 0x843   : > { %3562 = vlog2.f32 %v2475_v12 }
 0x850   : > { %v3563_v13 = vpop.eup %3562 }
 0x851   : > { %v2484_v14 = vmul.f32 0.6931472, %v3563_v13 }
 0x853   : > { %v2485_v15 = vadd.f32 %v2484_v14, %v4575_v62 }
 0x855   : > { %2486 = vst [vmem:[%s780_s9] sm:$0xff] %v2485_v15 }
 0x856   : > { %3918 = shalt.err (!%p3915_p5)
}
 0x857   : > { %s3919_s1 = scalar_lea.hbm %s4626_s14, 128  ;;  %s3923_s3 = scalar_lea.hbm %s4794_s8, 256 }
 0x858   : > { %p3920_p12 = scmp.ne.s32.totalorder %s4626_s14, %s3919_s1  ;;  %p3924_p4 = scmp.lt.s32.totalorder %s4626_s14, %s4794_s8 }
 0x859   : > { %p3925_p9 = scmp.lt.s32.totalorder %s3923_s3, %s3919_s1 }
 0x85a   : > { %p3921_p7 = pnand %p3920_p12, %p4329_p13 }
 0x85b   : > { %p3926_p1 = por %p3925_p9, %p3924_p4 }
 0x85c   : > { %p3922_p3 = pneg %p3921_p7 }
 0x85e   : > { %p3927_p6 = pnand %p3926_p1, %p3922_p3 }
 0x860   : > { %3930 = shalt.err (!%p3927_p6)
}
 0x861   : > { %3274 = dma.vmem_to_hbm [thread:$0]  (%p4329_p13), %s4628_s2, 128, %s4626_s14, %s4640_s4  }
 0x862   : > { %s3931_s25 = scalar_lea.vmem %s4636_s5, 128  ;;  %s4070_s7 = smov [#allocation26]  }
 0x863   : > { %p3932_p10 = scmp.ne.s32.totalorder %s4636_s5, %s3931_s25  ;;  %s3935_s22 = sshll.u32 %s4070_s7, 4  ;;  %s3936_s22 = int_to_ptr.vmem [resolvable:$false] %s3935_s22 }
 0x864   : > { %s3937_s26 = scalar_lea.vmem %s3936_s22, 256  ;;  %p3938_p8 = scmp.lt.s32.totalorder %s4636_s5, %s3936_s22 }
 0x865   : > { %p3933_p11 = pnand %p3932_p10, %p4329_p13  ;;  %p3939_p5 = scmp.lt.s32.totalorder %s3937_s26, %s3931_s25 }
 0x867   : > { %p3934_p0 = pneg %p3933_p11  ;;  %p3940_p12 = por %p3939_p5, %p3938_p8 }
 0x869   : > { %p3941_p7 = pnand %p3940_p12, %p3934_p0 }
 0x86b   : > { %3944 = shalt.err (!%p3941_p7)
}
 0x86c   : > { %s3945_s1 = scalar_lea.hbm %s4634_s18, 128  ;;  %s3949_s24 = scalar_lea.hbm %s4795_s20, 256 }
 0x86d   : > { %p3946_p3 = scmp.ne.s32.totalorder %s4634_s18, %s3945_s1  ;;  %p3950_p1 = scmp.lt.s32.totalorder %s4634_s18, %s4795_s20 }
 0x86e   : > { %p3951_p6 = scmp.lt.s32.totalorder %s3949_s24, %s3945_s1 }
 0x86f   : > { %p3947_p4 = pnand %p3946_p3, %p4329_p13 }
 0x870   : > { %p3952_p10 = por %p3951_p6, %p3950_p1 }
 0x871   : > { %p3948_p9 = pneg %p3947_p4 }
 0x873   : > { %p3953_p11 = pnand %p3952_p10, %p3948_p9 }
 0x875   : > { %3956 = shalt.err (!%p3953_p11)
}
 0x876   : > { %3275 = dma.vmem_to_hbm [thread:$0]  (%p4329_p13), %s4636_s5, 128, %s4634_s18, %s4640_s4  }
 0x877 PF: > { %s2569_s6 = sand.u32 1, %s4023_s27   ;;  %p4797_p0 = scmp.ge.s32.totalorder %s4043_s19, 2 }
 0x878   : > { %s2570_s17 = scalar_lea.sflag [#allocation7], %s2569_s6 }
 0x879   : > { %p3317_p8 = pnand %p4797_p0, %p4338_p2 }
 0x87b   : > { %p3318_p5 = pneg %p3317_p8 }
 0x87d   : > { %4010 = dma.done.wait (%p3318_p5), %s2570_s17, 256  }
 0x87e   : > { %4012 = vsyncadd (%p3318_p5), %s2570_s17, 4294967040  ;;  %s4798_s25 = sadd.s32 4294967294, %s4043_s19  }
 0x87f   : > { %s2578_s7 = sand.u32 1, %s4798_s25  }
 0x880   : > { %s2579_s21 = scalar_lea.sflag [#allocation25], %s2578_s7 }
 0x881   : > { %4014 = dma.done.wait (%p3318_p5), %s2579_s21, 256  }
 0x882   : > { %4016 = vsyncadd (%p3318_p5), %s2579_s21, 4294967040  ;;  %s2597_s22 = scalar_lea.sflag [#allocation28], %s2569_s6 }
 0x883   : > { %4018 = dma.done.wait (%p3318_p5), %s2597_s22, 128  }
 0x884   : > { %4020 = vsyncadd (%p3318_p5), %s2597_s22, 4294967168  ;;  %s44_s19 = sadd.s32 1, %s4043_s19   ;;  %s4799_s27 = smov %s4027_s28 }
 0x885   : > { %p41_p13 = scmp.ge.s32.totalorder %s44_s19, 4   ;;  %s4800_s28 = smov %s4031_s29 }
 0x886   : > { %s4801_s29 = smov %s4336_s30  ;;  %s4802_s30 = smov %s4039_s0 }
 0x887   : > { %s4803_s0 = smov %s4805_s15  ;;  %43 = sbr.rel (!%p41_p13) target bundleno = 30 (0x1e), region = 224 }
 0x88c   :  { %2602 = vsyncpa [#allocation6], 1 }
 0x88d   :  { %2604 = vsyncpa [#allocation6 + $0x1], 1 }
 0x88e   :  { %2605 = vsyncpa [#allocation9], 1 }
 0x88f   :  { %2606 = vsyncpa [#allocation12], 1 }
 0x890   :  { %2607 = vsyncpa [#allocation15], 1 }
 0x891   :  { %2608 = vsyncpa [#allocation18], 1 }
 0x892   :  { %2609 = vsyncpa [#allocation21], 1 }
 0x893   :  { %2610 = vsyncpa [#allocation7], 1 }
 0x894   :  { %2612 = vsyncpa [#allocation7 + $0x1], 1 }
 0x895   :  { %2613 = vsyncpa [#allocation25], 1 }
 0x896   :  { %2615 = vsyncpa [#allocation25 + $0x1], 1 }
 0x897   :  { %2616 = vsyncpa [#allocation28], 1 }
 0x898   :  { %2618 = vsyncpa [#allocation28 + $0x1], 1 }

</bundles_post_ra>
